<compile_context>
chip_gen: v6e
topology: v6e:2x2x1
jax: 0.10.0
libtpu: 0.0.40
codegen_flags: <defaults>
</compile_context>

<pallas_src>
import jax
import jax.numpy as jnp
import numpy as np
from jax.experimental import pallas as pl
from jax.experimental.pallas import tpu as pltpu

K = 4          # kernel height of every ConvTranspose2d
BN_EPS = 1e-5  # torch.nn.BatchNorm2d default
KPAD = 128     # zero-padded contraction depth for the layer-1 matmul


def _round8(x):
    return (x + 7) // 8 * 8


def g_kernel(z_ref, w1_ref, g1_ref, b1_ref, w2_ref, g2_ref, b2_ref, w3_ref,
             out_ref, cols1_ref, cols2_ref, cols3_ref):
    # z_ref    : (B, H0, 1)      input sequences (positions on sublanes)
    # w1_ref   : (KPAD, C1)      layer1 taps; rows [K:KPAD) are zero
    # g1/b1    : (1, C1)         bn1 gamma / beta
    # w2_ref   : (K*C1, C2)      layer2 taps, (kh, cin)-major rows
    # g2/b2    : (1, C2)         bn2 gamma / beta
    # w3_ref   : (1, K*C2)       layer3 taps, (kh, cin) lanes (Cout == 1)
    # out_ref  : (1, B*H3p)      lane-dense tanh(layer3) row
    # cols1/2/3: VMEM im2col staging (B,H1p,KPAD) / (B,H2p,K*C1) / (B,H3p,K*C2)
    B, H0, _ = z_ref.shape
    C1 = w1_ref.shape[1]
    C2 = g2_ref.shape[1]
    H1p, KC1 = cols1_ref.shape[1], cols2_ref.shape[2]
    H2p, KC2 = cols2_ref.shape[1], cols3_ref.shape[2]
    H3p = cols3_ref.shape[1]
    H1 = H0 + (K - 1)
    H2 = H1 + (K - 1)

    # ---- layer1: build z-im2col on chip, then one MXU matmul ----------------
    # cols1 is tiny (B*H1p*KPAD floats); a full zero-fill is a handful of
    # vector stores.  The K tap writes overwrite lanes [0, K).
    cols1_ref[...] = jnp.zeros(cols1_ref.shape, cols1_ref.dtype)
    z3 = z_ref[...]                                    # (B, H0, 1)
    for kh in range(K):
        cols1_ref[:, kh:kh + H0, kh:kh + 1] = z3       # cols1[b, kh+h0, kh] = z[b, h0]
    y1 = jnp.dot(cols1_ref[...].reshape(B * H1p, KPAD), w1_ref[...],
                 preferred_element_type=jnp.float32)   # (B*H1p, C1); pad rows = 0

    # ---- bn1 + ReLU (training-mode batch stats) -----------------------------
    # Padded rows of y1 are exactly zero, so plain sums divided by the true
    # element count give exact batch statistics.
    inv_n1 = jnp.float32(1.0 / (B * H1))
    m1 = jnp.sum(y1, axis=0, keepdims=True) * inv_n1               # E[x]
    q1 = jnp.sum(y1 * y1, axis=0, keepdims=True) * inv_n1          # E[x^2]
    var1 = jnp.maximum(q1 - m1 * m1, 0.0)                          # clamp cancellation
    sc1 = g1_ref[...] * jax.lax.rsqrt(var1 + BN_EPS)
    sh1 = b1_ref[...] - m1 * sc1
    y1 = jnp.maximum(y1 * sc1 + sh1, 0.0)                          # (B*H1p, C1)
    y1_3d = y1.reshape(B, H1p, C1)        # view: H1p % 8 == 0, C1 % 128 == 0

    # ---- layer2: boundary-only zero fill + shifted lane-aligned tap stores
    #      + one fused MXU matmul over the K*C1 contraction -------------------
    if K > 1:
        cols2_ref[:, 0:K - 1, :] = jnp.zeros((B, K - 1, KC1), jnp.float32)
    if H1 < H2p:
        cols2_ref[:, H1:H2p, :] = jnp.zeros((B, H2p - H1, KC1), jnp.float32)
    for kh in range(K):                   # lane offsets kh*C1 are 128-aligned
        cols2_ref[:, kh:kh + H1, kh * C1:(kh + 1) * C1] = y1_3d[:, :H1, :]
    t2 = jnp.dot(cols2_ref[...].reshape(B * H2p, KC1), w2_ref[...],
                 preferred_element_type=jnp.float32)               # (B*H2p, C2)

    # ---- bn2 + ReLU ----------------------------------------------------------
    inv_n2 = jnp.float32(1.0 / (B * H2))
    m2 = jnp.sum(t2, axis=0, keepdims=True) * inv_n2
    q2 = jnp.sum(t2 * t2, axis=0, keepdims=True) * inv_n2
    var2 = jnp.maximum(q2 - m2 * m2, 0.0)
    sc2 = g2_ref[...] * jax.lax.rsqrt(var2 + BN_EPS)
    sh2 = b2_ref[...] - m2 * sc2
    y2 = jnp.maximum(t2 * sc2 + sh2, 0.0)                          # (B*H2p, C2)
    y2_3d = y2.reshape(B, H2p, C2)        # view: H2p % 8 == 0, C2 % 128 == 0

    # ---- layer3: boundary-only zero fill + aligned tap stores + one matmul
    #      producing the lane-dense output row directly -----------------------
    if K > 1:
        cols3_ref[:, 0:K - 1, :] = jnp.zeros((B, K - 1, KC2), jnp.float32)
    if H2 < H3p:
        cols3_ref[:, H2:H3p, :] = jnp.zeros((B, H3p - H2, KC2), jnp.float32)
    for kh in range(K):                   # lane offsets kh*C2 are 128-aligned
        cols3_ref[:, kh:kh + H2, kh * C2:(kh + 1) * C2] = y2_3d[:, :H2, :]
    x3 = cols3_ref[...].reshape(B * H3p, KC2)                      # view
    # out[0, b*H3p + h3] = sum_j w3[0, j] * x3[b*H3p + h3, j]   (MXU, rhs^T form)
    t3 = jax.lax.dot_general(w3_ref[...], x3,
                             dimension_numbers=(((1,), (1,)), ((), ())),
                             preferred_element_type=jnp.float32)   # (1, B*H3p)
    out_ref[...] = jnp.tanh(t3)
    # TODO(synk): BatchNorm running_mean/running_var bookkeeping is not emitted
    # (training-mode forward output does not depend on it).
    # TODO(synk): single-TensorCore by design at B=2; splitting B across v7x's
    # two TCs needs cross-core partial-sum BN statistics (CMEM/VMEM_SHARED).


def g_forward(z_nchw, w1_t, g1, b1, w2_t, g2, b2, w3_t):
    """z_nchw: (N, nz=1, H0, W) like the PyTorch module; wX_t are the PyTorch
    ConvTranspose2d weights (Cin, Cout, kH=4, kW=1).  Returns (N, H0+9, 1, W),
    matching G.forward(z) == tanh(...).permute(0, 2, 1, 3)."""
    N, nz_, H0, W = z_nchw.shape
    assert nz_ == 1, "layer1 fast path assumes nz == 1 (as in the module spec)"
    C1 = w1_t.shape[1]
    C2 = w2_t.shape[1]
    H1, H2, H3 = H0 + (K - 1), H0 + 2 * (K - 1), H0 + 3 * (K - 1)
    H1p, H2p, H3p = _round8(H1), _round8(H2), _round8(H3)
    B = N * W

    # one independent 1-D sequence per (n, w); with W == 1 this is a pure reshape
    if W == 1:
        z_seq = z_nchw.reshape(B, H0, 1).astype(jnp.float32)
    else:
        z_seq = jnp.transpose(z_nchw[:, 0, :, :], (0, 2, 1)).reshape(B, H0, 1)
        z_seq = z_seq.astype(jnp.float32)

    # weight layout plumbing (PyTorch ConvTranspose2d weight is (Cin, Cout, kH, kW))
    w1 = jnp.transpose(w1_t[0, :, :, 0], (1, 0))                          # (K, C1)
    w1p = jnp.zeros((KPAD, C1), jnp.float32).at[:K, :].set(w1)            # (KPAD, C1)
    w2f = jnp.transpose(w2_t[:, :, :, 0], (2, 0, 1)).reshape(K * C1, C2)  # (K*C1, C2)
    w3f = jnp.transpose(w3_t[:, 0, :, 0], (1, 0)).reshape(1, K * C2)      # (1, K*C2)

    vmem = pl.BlockSpec(memory_space=pltpu.MemorySpace.VMEM)
    out_row = pl.pallas_call(
        g_kernel,
        out_shape=jax.ShapeDtypeStruct((1, B * H3p), jnp.float32),
        in_specs=[vmem] * 8,
        out_specs=vmem,
        scratch_shapes=[
            pltpu.VMEM((B, H1p, KPAD), jnp.float32),
            pltpu.VMEM((B, H2p, K * C1), jnp.float32),
            pltpu.VMEM((B, H3p, K * C2), jnp.float32),
        ],
        compiler_params=pltpu.CompilerParams(vmem_limit_bytes=32 * 1024 * 1024),
    )(z_seq, w1p, g1, b1, w2f, g2, b2, w3f)

    out = out_row.reshape(B, H3p)[:, :H3]          # drop sublane/pad positions
    if W == 1:
        return out.reshape(N, H3, 1, 1)
    return jnp.transpose(out.reshape(N, W, H3), (0, 2, 1))[:, :, None, :]


# ----------------------------- pure-JAX reference -----------------------------
def g_reference(z_nchw, w1_t, g1, b1, w2_t, g2, b2, w3_t):
    def convT(x, w_t):  # x: (N, Cin, H, W); w_t: (Cin, Cout, K, 1)
        Cin, Cout, Kk, _ = w_t.shape
        N, _, H, W = x.shape
        y = jnp.zeros((N, Cout, H + Kk - 1, W), jnp.float32)
        for kh in range(Kk):
            y = y.at[:, :, kh:kh + H, :].add(
                jnp.einsum('nchw,cd->ndhw', x, w_t[:, :, kh, 0]))
        return y

    def bn_relu(x, g, b):  # training-mode batch-norm over (N, H, W) per channel
        m = jnp.mean(x, axis=(0, 2, 3), keepdims=True)
        v = jnp.mean((x - m) ** 2, axis=(0, 2, 3), keepdims=True)
        gg = g.reshape(1, -1, 1, 1)
        bb = b.reshape(1, -1, 1, 1)
        return jnp.maximum((x - m) * jax.lax.rsqrt(v + BN_EPS) * gg + bb, 0.0)

    x = z_nchw.astype(jnp.float32)
    x = bn_relu(convT(x, w1_t), g1, b1)
    x = bn_relu(convT(x, w2_t), g2, b2)
    x = jnp.tanh(convT(x, w3_t))
    return jnp.transpose(x, (0, 2, 1, 3))   # .permute(0, 2, 1, 3)


if __name__ == "__main__":
    # Module spec: nz = 1, ngf = 64, nc = 1; z is NCHW = (N, nz, H0, W)
    N, nz, H0, W = 2, 1, 8, 1
    ngf = 64
    C1, C2 = ngf * 8, ngf * 2    # 512, 128 (lane-aligned channel widths)

    key = jax.random.PRNGKey(0)
    ks = jax.random.split(key, 8)

    # PyTorch ConvTranspose2d weight layout: (Cin, Cout, kH, kW)
    w1_t = 0.02 * jax.random.normal(ks[0], (nz, C1, K, 1), jnp.float32)
    w2_t = 0.02 * jax.random.normal(ks[1], (C1, C2, K, 1), jnp.float32)
    w3_t = 0.02 * jax.random.normal(ks[2], (C2, 1, K, 1), jnp.float32)

    g1 = 1.0 + 0.05 * jax.random.normal(ks[3], (1, C1), jnp.float32)
    b1 = 0.05 * jax.random.normal(ks[4], (1, C1), jnp.float32)
    g2 = 1.0 + 0.05 * jax.random.normal(ks[5], (1, C2), jnp.float32)
    b2 = 0.05 * jax.random.normal(ks[6], (1, C2), jnp.float32)

    z = jax.random.normal(ks[7], (N, nz, H0, W), jnp.float32)

    out = jax.jit(g_forward)(z, w1_t, g1, b1, w2_t, g2, b2, w3_t)
    out = jax.block_until_ready(out)

    ref = g_reference(z, w1_t, g1, b1, w2_t, g2, b2, w3_t)
    H3 = H0 + 3 * (K - 1)
    assert out.shape == (N, H3, 1, W), out.shape
    assert out.dtype == jnp.float32
    if not np.allclose(np.asarray(out), np.asarray(ref), atol=5e-3, rtol=5e-3):
        err = np.max(np.abs(np.asarray(out) - np.asarray(ref)))
        raise AssertionError(
            f"Pallas kernel output mismatch vs reference (max |diff| = {err})")

    print("KERNEL_OK")
</pallas_src>

<mosaic_0001>
module attributes {stable_mosaic.version = 11 : i64} {
  func.func @g_kernel(%arg0: memref<2x8x1xf32, #tpu.memory_space<vmem>>, %arg1: memref<128x512xf32, #tpu.memory_space<vmem>>, %arg2: memref<1x512xf32, #tpu.memory_space<vmem>>, %arg3: memref<1x512xf32, #tpu.memory_space<vmem>>, %arg4: memref<2048x128xf32, #tpu.memory_space<vmem>>, %arg5: memref<1x128xf32, #tpu.memory_space<vmem>>, %arg6: memref<1x128xf32, #tpu.memory_space<vmem>>, %arg7: memref<1x512xf32, #tpu.memory_space<vmem>>, %arg8: memref<1x48xf32, #tpu.memory_space<vmem>>, %arg9: memref<2x16x128xf32, #tpu.memory_space<vmem>>, %arg10: memref<2x16x2048xf32, #tpu.memory_space<vmem>>, %arg11: memref<2x24x512xf32, #tpu.memory_space<vmem>>) attributes {dimension_semantics = [], scalar_prefetch = 0 : i64, scratch_operands = 3 : i64, tpu.core_type = #tpu.core_type<tc>} {
    %cst = arith.constant 0.000000e+00 : f32
    %0 = vector.broadcast %cst : f32 to vector<2x16x128xf32>
    %c0 = arith.constant 0 : index
    %c0_0 = arith.constant 0 : index
    %c0_1 = arith.constant 0 : index
    %1 = vector.load %arg9[%c0, %c0_0, %c0_1] : memref<2x16x128xf32, #tpu.memory_space<vmem>>, vector<2x16x128xf32>
    tpu.vector_store %arg9[%c0, %c0_0, %c0_1], %0 {strides = array<i32>} : memref<2x16x128xf32, #tpu.memory_space<vmem>>, vector<2x16x128xf32>,
    %c0_2 = arith.constant 0 : index
    %c0_3 = arith.constant 0 : index
    %c0_4 = arith.constant 0 : index
    %2 = vector.load %arg0[%c0_2, %c0_3, %c0_4] : memref<2x8x1xf32, #tpu.memory_space<vmem>>, vector<2x8x1xf32>
    %c0_5 = arith.constant 0 : index
    %c0_6 = arith.constant 0 : index
    %c0_7 = arith.constant 0 : index
    %3 = vector.load %arg9[%c0_5, %c0_6, %c0_7] : memref<2x16x128xf32, #tpu.memory_space<vmem>>, vector<2x8x1xf32>
    tpu.vector_store %arg9[%c0_5, %c0_6, %c0_7], %2 {strides = array<i32>} : memref<2x16x128xf32, #tpu.memory_space<vmem>>, vector<2x8x1xf32>,
    %c0_8 = arith.constant 0 : index
    %c1 = arith.constant 1 : index
    %c1_9 = arith.constant 1 : index
    %4 = vector.load %arg9[%c0_8, %c1, %c1_9] : memref<2x16x128xf32, #tpu.memory_space<vmem>>, vector<2x8x1xf32>
    tpu.vector_store %arg9[%c0_8, %c1, %c1_9], %2 {strides = array<i32>} : memref<2x16x128xf32, #tpu.memory_space<vmem>>, vector<2x8x1xf32>,
    %c0_10 = arith.constant 0 : index
    %c2 = arith.constant 2 : index
    %c2_11 = arith.constant 2 : index
    %5 = vector.load %arg9[%c0_10, %c2, %c2_11] : memref<2x16x128xf32, #tpu.memory_space<vmem>>, vector<2x8x1xf32>
    tpu.vector_store %arg9[%c0_10, %c2, %c2_11], %2 {strides = array<i32>} : memref<2x16x128xf32, #tpu.memory_space<vmem>>, vector<2x8x1xf32>,
    %c0_12 = arith.constant 0 : index
    %c3 = arith.constant 3 : index
    %c3_13 = arith.constant 3 : index
    %6 = vector.load %arg9[%c0_12, %c3, %c3_13] : memref<2x16x128xf32, #tpu.memory_space<vmem>>, vector<2x8x1xf32>
    tpu.vector_store %arg9[%c0_12, %c3, %c3_13], %2 {strides = array<i32>} : memref<2x16x128xf32, #tpu.memory_space<vmem>>, vector<2x8x1xf32>,
    %c0_14 = arith.constant 0 : index
    %c0_15 = arith.constant 0 : index
    %c0_16 = arith.constant 0 : index
    %7 = vector.load %arg9[%c0_14, %c0_15, %c0_16] : memref<2x16x128xf32, #tpu.memory_space<vmem>>, vector<2x16x128xf32>
    %8 = vector.shape_cast %7 : vector<2x16x128xf32> to vector<32x128xf32>
    %c0_17 = arith.constant 0 : index
    %c0_18 = arith.constant 0 : index
    %9 = vector.load %arg1[%c0_17, %c0_18] : memref<128x512xf32, #tpu.memory_space<vmem>>, vector<128x512xf32>
    %cst_19 = arith.constant dense<0.000000e+00> : vector<32x512xf32>
    %10 = tpu.matmul %8, %9, %cst_19 {dimension_numbers = #tpu.dot_dimension_numbers<[1], [0], [0], [1], [0, 0, 1, 1], [], []>} : vector<32x128xf32>, vector<128x512xf32>, vector<32x512xf32> -> vector<32x512xf32>
    %cst_20 = arith.constant dense<0.000000e+00> : vector<512xf32>
    %11 = vector.multi_reduction <add>, %10, %cst_20 [0] : vector<32x512xf32> to vector<512xf32>
    %12 = vector.shape_cast %11 : vector<512xf32> to vector<1x512xf32>
    %cst_21 = arith.constant 0.0454545468 : f32
    %13 = vector.broadcast %cst_21 : f32 to vector<1x512xf32>
    %14 = arith.mulf %12, %13 : vector<1x512xf32>
    %15 = arith.mulf %10, %10 : vector<32x512xf32>
    %cst_22 = arith.constant dense<0.000000e+00> : vector<512xf32>
    %16 = vector.multi_reduction <add>, %15, %cst_22 [0] : vector<32x512xf32> to vector<512xf32>
    %17 = vector.shape_cast %16 : vector<512xf32> to vector<1x512xf32>
    %cst_23 = arith.constant 0.0454545468 : f32
    %18 = vector.broadcast %cst_23 : f32 to vector<1x512xf32>
    %19 = arith.mulf %17, %18 : vector<1x512xf32>
    %20 = arith.mulf %14, %14 : vector<1x512xf32>
    %21 = arith.subf %19, %20 : vector<1x512xf32>
    %cst_24 = arith.constant 0.000000e+00 : f32
    %22 = vector.broadcast %cst_24 : f32 to vector<1x512xf32>
    %23 = arith.maximumf %21, %22 : vector<1x512xf32>
    %c0_25 = arith.constant 0 : index
    %c0_26 = arith.constant 0 : index
    %24 = vector.load %arg2[%c0_25, %c0_26] : memref<1x512xf32, #tpu.memory_space<vmem>>, vector<1x512xf32>
    %cst_27 = arith.constant 9.99999974E-6 : f32
    %25 = vector.broadcast %cst_27 : f32 to vector<1x512xf32>
    %26 = arith.addf %23, %25 : vector<1x512xf32>
    %27 = math.rsqrt %26 : vector<1x512xf32>
    %28 = arith.mulf %24, %27 : vector<1x512xf32>
    %c0_28 = arith.constant 0 : index
    %c0_29 = arith.constant 0 : index
    %29 = vector.load %arg3[%c0_28, %c0_29] : memref<1x512xf32, #tpu.memory_space<vmem>>, vector<1x512xf32>
    %30 = arith.mulf %14, %28 : vector<1x512xf32>
    %31 = arith.subf %29, %30 : vector<1x512xf32>
    %32 = vector.broadcast %28 : vector<1x512xf32> to vector<32x512xf32>
    %33 = arith.mulf %10, %32 : vector<32x512xf32>
    %34 = vector.broadcast %31 : vector<1x512xf32> to vector<32x512xf32>
    %35 = arith.addf %33, %34 : vector<32x512xf32>
    %cst_30 = arith.constant 0.000000e+00 : f32
    %36 = vector.broadcast %cst_30 : f32 to vector<32x512xf32>
    %37 = arith.maximumf %35, %36 : vector<32x512xf32>
    %38 = vector.shape_cast %37 : vector<32x512xf32> to vector<2x16x512xf32>
    %cst_31 = arith.constant 0.000000e+00 : f32
    %39 = vector.broadcast %cst_31 : f32 to vector<2x3x2048xf32>
    %c0_32 = arith.constant 0 : index
    %c0_33 = arith.constant 0 : index
    %c0_34 = arith.constant 0 : index
    %40 = vector.load %arg10[%c0_32, %c0_33, %c0_34] : memref<2x16x2048xf32, #tpu.memory_space<vmem>>, vector<2x3x2048xf32>
    tpu.vector_store %arg10[%c0_32, %c0_33, %c0_34], %39 {strides = array<i32>} : memref<2x16x2048xf32, #tpu.memory_space<vmem>>, vector<2x3x2048xf32>,
    %cst_35 = arith.constant 0.000000e+00 : f32
    %41 = vector.broadcast %cst_35 : f32 to vector<2x5x2048xf32>
    %c0_36 = arith.constant 0 : index
    %c11 = arith.constant 11 : index
    %c0_37 = arith.constant 0 : index
    %42 = vector.load %arg10[%c0_36, %c11, %c0_37] : memref<2x16x2048xf32, #tpu.memory_space<vmem>>, vector<2x5x2048xf32>
    tpu.vector_store %arg10[%c0_36, %c11, %c0_37], %41 {strides = array<i32>} : memref<2x16x2048xf32, #tpu.memory_space<vmem>>, vector<2x5x2048xf32>,
    %43 = vector.extract_strided_slice %38 {offsets = [0, 0, 0], sizes = [2, 11, 512], strides = [1, 1, 1]} : vector<2x16x512xf32> to vector<2x11x512xf32>
    %c0_38 = arith.constant 0 : index
    %c0_39 = arith.constant 0 : index
    %c0_40 = arith.constant 0 : index
    %44 = vector.load %arg10[%c0_38, %c0_39, %c0_40] : memref<2x16x2048xf32, #tpu.memory_space<vmem>>, vector<2x11x512xf32>
    tpu.vector_store %arg10[%c0_38, %c0_39, %c0_40], %43 {strides = array<i32>} : memref<2x16x2048xf32, #tpu.memory_space<vmem>>, vector<2x11x512xf32>,
    %45 = vector.extract_strided_slice %38 {offsets = [0, 0, 0], sizes = [2, 11, 512], strides = [1, 1, 1]} : vector<2x16x512xf32> to vector<2x11x512xf32>
    %c0_41 = arith.constant 0 : index
    %c1_42 = arith.constant 1 : index
    %c512 = arith.constant 512 : index
    %46 = vector.load %arg10[%c0_41, %c1_42, %c512] : memref<2x16x2048xf32, #tpu.memory_space<vmem>>, vector<2x11x512xf32>
    tpu.vector_store %arg10[%c0_41, %c1_42, %c512], %45 {strides = array<i32>} : memref<2x16x2048xf32, #tpu.memory_space<vmem>>, vector<2x11x512xf32>,
    %47 = vector.extract_strided_slice %38 {offsets = [0, 0, 0], sizes = [2, 11, 512], strides = [1, 1, 1]} : vector<2x16x512xf32> to vector<2x11x512xf32>
    %c0_43 = arith.constant 0 : index
    %c2_44 = arith.constant 2 : index
    %c1024 = arith.constant 1024 : index
    %48 = vector.load %arg10[%c0_43, %c2_44, %c1024] : memref<2x16x2048xf32, #tpu.memory_space<vmem>>, vector<2x11x512xf32>
    tpu.vector_store %arg10[%c0_43, %c2_44, %c1024], %47 {strides = array<i32>} : memref<2x16x2048xf32, #tpu.memory_space<vmem>>, vector<2x11x512xf32>,
    %49 = vector.extract_strided_slice %38 {offsets = [0, 0, 0], sizes = [2, 11, 512], strides = [1, 1, 1]} : vector<2x16x512xf32> to vector<2x11x512xf32>
    %c0_45 = arith.constant 0 : index
    %c3_46 = arith.constant 3 : index
    %c1536 = arith.constant 1536 : index
    %50 = vector.load %arg10[%c0_45, %c3_46, %c1536] : memref<2x16x2048xf32, #tpu.memory_space<vmem>>, vector<2x11x512xf32>
    tpu.vector_store %arg10[%c0_45, %c3_46, %c1536], %49 {strides = array<i32>} : memref<2x16x2048xf32, #tpu.memory_space<vmem>>, vector<2x11x512xf32>,
    %c0_47 = arith.constant 0 : index
    %c0_48 = arith.constant 0 : index
    %c0_49 = arith.constant 0 : index
    %51 = vector.load %arg10[%c0_47, %c0_48, %c0_49] : memref<2x16x2048xf32, #tpu.memory_space<vmem>>, vector<2x16x2048xf32>
    %52 = vector.shape_cast %51 : vector<2x16x2048xf32> to vector<32x2048xf32>
    %c0_50 = arith.constant 0 : index
    %c0_51 = arith.constant 0 : index
    %53 = vector.load %arg4[%c0_50, %c0_51] : memref<2048x128xf32, #tpu.memory_space<vmem>>, vector<2048x128xf32>
    %cst_52 = arith.constant dense<0.000000e+00> : vector<32x128xf32>
    %54 = tpu.matmul %52, %53, %cst_52 {dimension_numbers = #tpu.dot_dimension_numbers<[1], [0], [0], [1], [0, 0, 1, 1], [], []>} : vector<32x2048xf32>, vector<2048x128xf32>, vector<32x128xf32> -> vector<32x128xf32>
    %cst_53 = arith.constant dense<0.000000e+00> : vector<128xf32>
    %55 = vector.multi_reduction <add>, %54, %cst_53 [0] : vector<32x128xf32> to vector<128xf32>
    %56 = vector.shape_cast %55 : vector<128xf32> to vector<1x128xf32>
    %cst_54 = arith.constant 0.0357142873 : f32
    %57 = vector.broadcast %cst_54 : f32 to vector<1x128xf32>
    %58 = arith.mulf %56, %57 : vector<1x128xf32>
    %59 = arith.mulf %54, %54 : vector<32x128xf32>
    %cst_55 = arith.constant dense<0.000000e+00> : vector<128xf32>
    %60 = vector.multi_reduction <add>, %59, %cst_55 [0] : vector<32x128xf32> to vector<128xf32>
    %61 = vector.shape_cast %60 : vector<128xf32> to vector<1x128xf32>
    %cst_56 = arith.constant 0.0357142873 : f32
    %62 = vector.broadcast %cst_56 : f32 to vector<1x128xf32>
    %63 = arith.mulf %61, %62 : vector<1x128xf32>
    %64 = arith.mulf %58, %58 : vector<1x128xf32>
    %65 = arith.subf %63, %64 : vector<1x128xf32>
    %cst_57 = arith.constant 0.000000e+00 : f32
    %66 = vector.broadcast %cst_57 : f32 to vector<1x128xf32>
    %67 = arith.maximumf %65, %66 : vector<1x128xf32>
    %c0_58 = arith.constant 0 : index
    %c0_59 = arith.constant 0 : index
    %68 = vector.load %arg5[%c0_58, %c0_59] : memref<1x128xf32, #tpu.memory_space<vmem>>, vector<1x128xf32>
    %cst_60 = arith.constant 9.99999974E-6 : f32
    %69 = vector.broadcast %cst_60 : f32 to vector<1x128xf32>
    %70 = arith.addf %67, %69 : vector<1x128xf32>
    %71 = math.rsqrt %70 : vector<1x128xf32>
    %72 = arith.mulf %68, %71 : vector<1x128xf32>
    %c0_61 = arith.constant 0 : index
    %c0_62 = arith.constant 0 : index
    %73 = vector.load %arg6[%c0_61, %c0_62] : memref<1x128xf32, #tpu.memory_space<vmem>>, vector<1x128xf32>
    %74 = arith.mulf %58, %72 : vector<1x128xf32>
    %75 = arith.subf %73, %74 : vector<1x128xf32>
    %76 = vector.broadcast %72 : vector<1x128xf32> to vector<32x128xf32>
    %77 = arith.mulf %54, %76 : vector<32x128xf32>
    %78 = vector.broadcast %75 : vector<1x128xf32> to vector<32x128xf32>
    %79 = arith.addf %77, %78 : vector<32x128xf32>
    %cst_63 = arith.constant 0.000000e+00 : f32
    %80 = vector.broadcast %cst_63 : f32 to vector<32x128xf32>
    %81 = arith.maximumf %79, %80 : vector<32x128xf32>
    %82 = vector.shape_cast %81 : vector<32x128xf32> to vector<2x16x128xf32>
    %cst_64 = arith.constant 0.000000e+00 : f32
    %83 = vector.broadcast %cst_64 : f32 to vector<2x3x512xf32>
    %c0_65 = arith.constant 0 : index
    %c0_66 = arith.constant 0 : index
    %c0_67 = arith.constant 0 : index
    %84 = vector.load %arg11[%c0_65, %c0_66, %c0_67] : memref<2x24x512xf32, #tpu.memory_space<vmem>>, vector<2x3x512xf32>
    tpu.vector_store %arg11[%c0_65, %c0_66, %c0_67], %83 {strides = array<i32>} : memref<2x24x512xf32, #tpu.memory_space<vmem>>, vector<2x3x512xf32>,
    %cst_68 = arith.constant 0.000000e+00 : f32
    %85 = vector.broadcast %cst_68 : f32 to vector<2x10x512xf32>
    %c0_69 = arith.constant 0 : index
    %c14 = arith.constant 14 : index
    %c0_70 = arith.constant 0 : index
    %86 = vector.load %arg11[%c0_69, %c14, %c0_70] : memref<2x24x512xf32, #tpu.memory_space<vmem>>, vector<2x10x512xf32>
    tpu.vector_store %arg11[%c0_69, %c14, %c0_70], %85 {strides = array<i32>} : memref<2x24x512xf32, #tpu.memory_space<vmem>>, vector<2x10x512xf32>,
    %87 = vector.extract_strided_slice %82 {offsets = [0, 0, 0], sizes = [2, 14, 128], strides = [1, 1, 1]} : vector<2x16x128xf32> to vector<2x14x128xf32>
    %c0_71 = arith.constant 0 : index
    %c0_72 = arith.constant 0 : index
    %c0_73 = arith.constant 0 : index
    %88 = vector.load %arg11[%c0_71, %c0_72, %c0_73] : memref<2x24x512xf32, #tpu.memory_space<vmem>>, vector<2x14x128xf32>
    tpu.vector_store %arg11[%c0_71, %c0_72, %c0_73], %87 {strides = array<i32>} : memref<2x24x512xf32, #tpu.memory_space<vmem>>, vector<2x14x128xf32>,
    %89 = vector.extract_strided_slice %82 {offsets = [0, 0, 0], sizes = [2, 14, 128], strides = [1, 1, 1]} : vector<2x16x128xf32> to vector<2x14x128xf32>
    %c0_74 = arith.constant 0 : index
    %c1_75 = arith.constant 1 : index
    %c128 = arith.constant 128 : index
    %90 = vector.load %arg11[%c0_74, %c1_75, %c128] : memref<2x24x512xf32, #tpu.memory_space<vmem>>, vector<2x14x128xf32>
    tpu.vector_store %arg11[%c0_74, %c1_75, %c128], %89 {strides = array<i32>} : memref<2x24x512xf32, #tpu.memory_space<vmem>>, vector<2x14x128xf32>,
    %91 = vector.extract_strided_slice %82 {offsets = [0, 0, 0], sizes = [2, 14, 128], strides = [1, 1, 1]} : vector<2x16x128xf32> to vector<2x14x128xf32>
    %c0_76 = arith.constant 0 : index
    %c2_77 = arith.constant 2 : index
    %c256 = arith.constant 256 : index
    %92 = vector.load %arg11[%c0_76, %c2_77, %c256] : memref<2x24x512xf32, #tpu.memory_space<vmem>>, vector<2x14x128xf32>
    tpu.vector_store %arg11[%c0_76, %c2_77, %c256], %91 {strides = array<i32>} : memref<2x24x512xf32, #tpu.memory_space<vmem>>, vector<2x14x128xf32>,
    %93 = vector.extract_strided_slice %82 {offsets = [0, 0, 0], sizes = [2, 14, 128], strides = [1, 1, 1]} : vector<2x16x128xf32> to vector<2x14x128xf32>
    %c0_78 = arith.constant 0 : index
    %c3_79 = arith.constant 3 : index
    %c384 = arith.constant 384 : index
    %94 = vector.load %arg11[%c0_78, %c3_79, %c384] : memref<2x24x512xf32, #tpu.memory_space<vmem>>, vector<2x14x128xf32>
    tpu.vector_store %arg11[%c0_78, %c3_79, %c384], %93 {strides = array<i32>} : memref<2x24x512xf32, #tpu.memory_space<vmem>>, vector<2x14x128xf32>,
    %c0_80 = arith.constant 0 : index
    %c0_81 = arith.constant 0 : index
    %c0_82 = arith.constant 0 : index
    %95 = vector.load %arg11[%c0_80, %c0_81, %c0_82] : memref<2x24x512xf32, #tpu.memory_space<vmem>>, vector<2x24x512xf32>
    %96 = vector.shape_cast %95 : vector<2x24x512xf32> to vector<48x512xf32>
    %c0_83 = arith.constant 0 : index
    %c0_84 = arith.constant 0 : index
    %97 = vector.load %arg7[%c0_83, %c0_84] : memref<1x512xf32, #tpu.memory_space<vmem>>, vector<1x512xf32>
    %cst_85 = arith.constant dense<0.000000e+00> : vector<1x48xf32>
    %98 = tpu.matmul %97, %96, %cst_85 {dimension_numbers = #tpu.dot_dimension_numbers<[1], [1], [0], [0], [0, 0, 1, 0], [], []>} : vector<1x512xf32>, vector<48x512xf32>, vector<1x48xf32> -> vector<1x48xf32>
    %99 = math.tanh %98 : vector<1x48xf32>
    %c0_86 = arith.constant 0 : index
    %c0_87 = arith.constant 0 : index
    %100 = vector.load %arg8[%c0_86, %c0_87] : memref<1x48xf32, #tpu.memory_space<vmem>>, vector<1x48xf32>
    tpu.vector_store %arg8[%c0_86, %c0_87], %99 {strides = array<i32>} : memref<1x48xf32, #tpu.memory_space<vmem>>, vector<1x48xf32>,
    return
  }
}

</mosaic_0001>

<bundles_post_ra>
// kernel: g_forward.1
= control target key start
LH: loop header
LB: loop body
LE: loop exit
PB: predicated region body
PF: predicated region fallthrough
CT: control target
= control target key end

     0   :  { %vm35_vm0 = vcmask 7168   ;;  %v2551_v3 = vmov 0.0   ;;  %s2553_s11 = smov 3   ;;  %s2554_s30 = smov 2   ;;  %vm46_vm1 = vcmask 15368   ;;  %vm55_vm2 = vcmask 23568   ;;  %s3965_s0 = inlined_call_operand.vmem [shape: f32[2,8,1], index: 0, kind: input, shape index: {}]   ;;  %s3966_s1 = inlined_call_operand.vmem [shape: f32[128,512], index: 1, kind: input, shape index: {}]   ;;  %s3967_s4 = inlined_call_operand.vmem [shape: f32[2048,128], index: 4, kind: input, shape index: {}]   ;;  %s3968_s2 = inlined_call_operand.vmem [shape: f32[1,512], index: 2, kind: input, shape index: {}]   ;;  %s3969_s3 = inlined_call_operand.vmem [shape: f32[1,512], index: 3, kind: input, shape index: {}]   ;;  %s3970_s7 = inlined_call_operand.vmem [shape: f32[1,512], index: 7, kind: input, shape index: {}]   ;;  %s3971_s5 = inlined_call_operand.vmem [shape: f32[1,128], index: 5, kind: input, shape index: {}]   ;;  %s3972_s6 = inlined_call_operand.vmem [shape: f32[1,128], index: 6, kind: input, shape index: {}]   ;;  %s3973_s8 = inlined_call_operand.vmem [shape: f32[1,48], index: 8, kind: output, shape index: {}]  }
   0x1   :  { %v2604_v0 = vld [vmem:[%s3965_s0] sm:$0xff]  ;;  %v2609_v1 = vld [vmem:[%s3965_s0 + $0x8] sm:$0xff]  ;;  %29 = vst [vmem:[#allocation2] sm:$0xff] %v2551_v3  ;;  %30 = vst [vmem:[#allocation2 + $0x8] sm:$0xff] %v2551_v3  ;;  %199 = vmatprep.mubr.f32.mxu0 %v2551_v3  ;;  %288 = vmatprep.mubr.f32.mxu1 %v2551_v3  ;;  %s2552_s0 = smov 1   ;;  %vm64_vm3 = vcmask 31768  }
   0x2   :  { %v2614_v2 = vld [vmem:[%s3966_s1 + $0x1e8] sm:$0xff]  ;;  %31 = vst [vmem:[#allocation2 + $0x10] sm:$0xff] %v2551_v3  ;;  %32 = vst [vmem:[#allocation2 + $0x18] sm:$0xff] %v2551_v3  ;;  %40 = vrot.lane.b32.xlu0 %v2604_v0, %s2552_s0  ;;  %58 = vrot.lane.b32.xlu1 %v2604_v0, %s2553_s11  ;;  %v134_v4 = vld [vmem:[%s3966_s1 + $0x1f8] sm:$0xff]  ;;  %vm681_vm4 = vcmask 1040384   ;;  %vm738_vm5 = vcmask 1041408  }
   0x3   :  { %589 = vst [vmem:[#allocation3 + $0x50] sm:$0x7] %v2551_v3  ;;  %590 = vst [vmem:[#allocation3 + $0xe8] sm:$0x7] %v2551_v3  ;;  %v131_v5 = vld [vmem:[%s3966_s1 + $0x1e0] sm:$0xff]  ;;  %135 = vmatprep.subr.mxu0 %v2614_v2  ;;  %224 = vmatprep.subr.mxu1 %v134_v4  ;;  %v133_v6 = vld [vmem:[%s3966_s1 + $0x1f0] sm:$0xff] }
   0x4   :  { %591 = vst [vmem:[#allocation3 + $0xb0] sm:$0x7] %v2551_v3  ;;  %592 = vst [vmem:[#allocation3 + $0x48] sm:$0x7] %v2551_v3  ;;  %v128_v7 = vld [vmem:[%s3966_s1 + $0x1c8] sm:$0xff]  ;;  %v130_v8 = vld [vmem:[%s3966_s1 + $0x1d8] sm:$0xff]  ;;  %136 = vmatpush1.msra.mxu0 %v131_v5  ;;  %225 = vmatpush1.msra.mxu1 %v133_v6 }
   0x5   :  { %593 = vst [vmem:[#allocation3 + $0x180] sm:$0x7] %v2551_v3  ;;  %594 = vst [vmem:[#allocation3 + $0x90] sm:$0x7] %v2551_v3  ;;  %v127_v9 = vld [vmem:[%s3966_s1 + $0x1c0] sm:$0xff]  ;;  %v129_v10 = vld [vmem:[%s3966_s1 + $0x1d0] sm:$0xff]  ;;  %137 = vmatprep.subr.mxu0 %v128_v7  ;;  %226 = vmatprep.subr.mxu1 %v130_v8 }
   0x6   :  { %595 = vst [vmem:[#allocation3 + $0x98] sm:$0x7] %v2551_v3  ;;  %596 = vst [vmem:[#allocation3 + $0x118] sm:$0x7] %v2551_v3  ;;  %v124_v11 = vld [vmem:[%s3966_s1 + $0x1a8] sm:$0xff]  ;;  %v126_v12 = vld [vmem:[%s3966_s1 + $0x1b8] sm:$0xff]  ;;  %49 = vrot.lane.b32.xlu0 %v2604_v0, %s2554_s30  ;;  %42 = vrot.lane.b32.xlu1 %v2609_v1, %s2552_s0 }
   0x7   :  { %597 = vst [vmem:[#allocation3 + $0xa0] sm:$0x7] %v2551_v3  ;;  %598 = vst [vmem:[#allocation3 + $0xd0] sm:$0x7] %v2551_v3  ;;  %v123_v13 = vld [vmem:[%s3966_s1 + $0x1a0] sm:$0xff]  ;;  %v125_v14 = vld [vmem:[%s3966_s1 + $0x1b0] sm:$0xff]  ;;  %138 = vmatpush1.msra.mxu0 %v127_v9  ;;  %227 = vmatpush1.msra.mxu1 %v129_v10 }
   0x8   :  { %599 = vst [vmem:[#allocation3 + $0x88] sm:$0x7] %v2551_v3  ;;  %600 = vst [vmem:[#allocation3 + $0x60] sm:$0x7] %v2551_v3  ;;  %139 = vmatprep.subr.mxu0 %v124_v11  ;;  %228 = vmatprep.subr.mxu1 %v126_v12  ;;  %v120_v15 = vld [vmem:[%s3966_s1 + $0x188] sm:$0xff]  ;;  %v122_v16 = vld [vmem:[%s3966_s1 + $0x198] sm:$0xff] }
   0x9   :  { %605 = vst [vmem:[#allocation3 + $0x100] sm:$0x7] %v2551_v3  ;;  %606 = vst [vmem:[#allocation3 + $0x1a8] sm:$0x7] %v2551_v3  ;;  %140 = vmatpush1.msra.mxu0 %v123_v13  ;;  %229 = vmatpush1.msra.mxu1 %v125_v14  ;;  %v119_v17 = vld [vmem:[%s3966_s1 + $0x180] sm:$0xff]  ;;  %v121_v18 = vld [vmem:[%s3966_s1 + $0x190] sm:$0xff] }
   0xa   :  { %607 = vst [vmem:[#allocation3 + $0x1b8] sm:$0x7] %v2551_v3  ;;  %608 = vst [vmem:[#allocation3 + $0x28] sm:$0x7] %v2551_v3  ;;  %51 = vrot.lane.b32.xlu0 %v2609_v1, %s2554_s30  ;;  %60 = vrot.lane.b32.xlu1 %v2609_v1, %s2553_s11  ;;  %v116_v19 = vld [vmem:[%s3966_s1 + $0x168] sm:$0xff]  ;;  %v118_v20 = vld [vmem:[%s3966_s1 + $0x178] sm:$0xff] }
   0xb   :  { %609 = vst [vmem:[#allocation3 + $0x1e8] sm:$0x7] %v2551_v3  ;;  %610 = vst [vmem:[#allocation3 + $0x178] sm:$0x7] %v2551_v3  ;;  %141 = vmatprep.subr.mxu0 %v120_v15  ;;  %230 = vmatprep.subr.mxu1 %v122_v16  ;;  %v115_v21 = vld [vmem:[%s3966_s1 + $0x160] sm:$0xff]  ;;  %v117_v22 = vld [vmem:[%s3966_s1 + $0x170] sm:$0xff] }
   0xc   :  { %611 = vst [vmem:[#allocation3 + $0xe0] sm:$0x7] %v2551_v3  ;;  %612 = vst [vmem:[#allocation3 + $0x30] sm:$0x7] %v2551_v3  ;;  %142 = vmatpush1.msra.mxu0 %v119_v17  ;;  %231 = vmatpush1.msra.mxu1 %v121_v18  ;;  %v112_v23 = vld [vmem:[%s3966_s1 + $0x148] sm:$0xff]  ;;  %v114_v24 = vld [vmem:[%s3966_s1 + $0x158] sm:$0xff] }
   0xd   :  { %613 = vst [vmem:[#allocation3 + $0x1e0] sm:$0x7] %v2551_v3  ;;  %614 = vst [vmem:[#allocation3] sm:$0x7] %v2551_v3  ;;  %143 = vmatprep.subr.mxu0 %v116_v19  ;;  %232 = vmatprep.subr.mxu1 %v118_v20  ;;  %v111_v25 = vld [vmem:[%s3966_s1 + $0x140] sm:$0xff]  ;;  %v113_v26 = vld [vmem:[%s3966_s1 + $0x150] sm:$0xff] }
   0xe   :  { %615 = vst [vmem:[#allocation3 + $0x170] sm:$0x7] %v2551_v3  ;;  %616 = vst [vmem:[#allocation3 + $0x8] sm:$0x7] %v2551_v3  ;;  %144 = vmatpush1.msra.mxu0 %v115_v21  ;;  %233 = vmatpush1.msra.mxu1 %v117_v22  ;;  %v108_v27 = vld [vmem:[%s3966_s1 + $0x128] sm:$0xff]  ;;  %v110_v28 = vld [vmem:[%s3966_s1 + $0x138] sm:$0xff] }
   0xf   :  { %617 = vst [vmem:[#allocation3 + $0xc8] sm:$0xf8] %v2551_v3  ;;  %618 = vst [vmem:[#allocation3 + $0x1d0] sm:$0xf8] %v2551_v3  ;;  %145 = vmatprep.subr.mxu0 %v112_v23  ;;  %234 = vmatprep.subr.mxu1 %v114_v24  ;;  %v107_v29 = vld [vmem:[%s3966_s1 + $0x120] sm:$0xff]  ;;  %v109_v30 = vld [vmem:[%s3966_s1 + $0x130] sm:$0xff] }
  0x10   :  { %619 = vst [vmem:[#allocation3 + $0x80] sm:$0xf8] %v2551_v3  ;;  %620 = vst [vmem:[#allocation3 + $0x148] sm:$0xf8] %v2551_v3  ;;  %146 = vmatpush1.msra.mxu0 %v111_v25  ;;  %235 = vmatpush1.msra.mxu1 %v113_v26  ;;  %v104_v31 = vld [vmem:[%s3966_s1 + $0x108] sm:$0xff]  ;;  %v106_v32 = vld [vmem:[%s3966_s1 + $0x118] sm:$0xff] }
  0x11   :  { %621 = vst [vmem:[#allocation3 + $0x40] sm:$0xf8] %v2551_v3  ;;  %622 = vst [vmem:[#allocation3 + $0x1f8] sm:$0xf8] %v2551_v3  ;;  %147 = vmatprep.subr.mxu0 %v108_v27  ;;  %236 = vmatprep.subr.mxu1 %v110_v28  ;;  %v103_v33 = vld [vmem:[%s3966_s1 + $0x100] sm:$0xff]  ;;  %v105_v34 = vld [vmem:[%s3966_s1 + $0x110] sm:$0xff] }
  0x12   :  { %623 = vst [vmem:[#allocation3 + $0x20] sm:$0xf8] %v2551_v3  ;;  %624 = vst [vmem:[#allocation3 + $0xa8] sm:$0xf8] %v2551_v3  ;;  %148 = vmatpush1.msra.mxu0 %v107_v29  ;;  %237 = vmatpush1.msra.mxu1 %v109_v30  ;;  %v100_v35 = vld [vmem:[%s3966_s1 + $0xe8] sm:$0xff]  ;;  %v102_v36 = vld [vmem:[%s3966_s1 + $0xf8] sm:$0xff] }
  0x13   :  { %625 = vst [vmem:[#allocation3 + $0x1a0] sm:$0xf8] %v2551_v3  ;;  %626 = vst [vmem:[#allocation3 + $0x1f0] sm:$0xf8] %v2551_v3  ;;  %149 = vmatprep.subr.mxu0 %v104_v31  ;;  %238 = vmatprep.subr.mxu1 %v106_v32  ;;  %v99_v37 = vld [vmem:[%s3966_s1 + $0xe0] sm:$0xff]  ;;  %v101_v38 = vld [vmem:[%s3966_s1 + $0xf0] sm:$0xff] }
  0x14   :  { %627 = vst [vmem:[#allocation3 + $0x168] sm:$0xf8] %v2551_v3  ;;  %628 = vst [vmem:[#allocation3 + $0x78] sm:$0xf8] %v2551_v3  ;;  %150 = vmatpush1.msra.mxu0 %v103_v33  ;;  %239 = vmatpush1.msra.mxu1 %v105_v34  ;;  %v96_v39 = vld [vmem:[%s3966_s1 + $0xc8] sm:$0xff]  ;;  %v98_v40 = vld [vmem:[%s3966_s1 + $0xd8] sm:$0xff] }
  0x15   :  { %629 = vst [vmem:[#allocation3 + $0x70] sm:$0xf8] %v2551_v3  ;;  %630 = vst [vmem:[#allocation3 + $0x110] sm:$0xf8] %v2551_v3  ;;  %151 = vmatprep.subr.mxu0 %v100_v35  ;;  %240 = vmatprep.subr.mxu1 %v102_v36  ;;  %v95_v41 = vld [vmem:[%s3966_s1 + $0xc0] sm:$0xff]  ;;  %v97_v42 = vld [vmem:[%s3966_s1 + $0xd0] sm:$0xff] }
  0x16   :  { %631 = vst [vmem:[#allocation3 + $0x1d8] sm:$0xf8] %v2551_v3  ;;  %632 = vst [vmem:[#allocation3 + $0x150] sm:$0xf8] %v2551_v3  ;;  %152 = vmatpush1.msra.mxu0 %v99_v37  ;;  %241 = vmatpush1.msra.mxu1 %v101_v38  ;;  %v92_v43 = vld [vmem:[%s3966_s1 + $0xa8] sm:$0xff]  ;;  %v94_v44 = vld [vmem:[%s3966_s1 + $0xb8] sm:$0xff] }
  0x17   :  { %633 = vst [vmem:[#allocation3 + $0x138] sm:$0xf8] %v2551_v3  ;;  %634 = vst [vmem:[#allocation3 + $0x108] sm:$0xf8] %v2551_v3  ;;  %153 = vmatprep.subr.mxu0 %v96_v39  ;;  %242 = vmatprep.subr.mxu1 %v98_v40  ;;  %v91_v45 = vld [vmem:[%s3966_s1 + $0xa0] sm:$0xff]  ;;  %v93_v46 = vld [vmem:[%s3966_s1 + $0xb0] sm:$0xff] }
  0x18   :  { %635 = vst [vmem:[#allocation3 + $0x128] sm:$0xf8] %v2551_v3  ;;  %636 = vst [vmem:[#allocation3 + $0x1c8] sm:$0xf8] %v2551_v3  ;;  %154 = vmatpush1.msra.mxu0 %v95_v41  ;;  %243 = vmatpush1.msra.mxu1 %v97_v42  ;;  %v88_v47 = vld [vmem:[%s3966_s1 + $0x88] sm:$0xff]  ;;  %v90_v48 = vld [vmem:[%s3966_s1 + $0x98] sm:$0xff] }
  0x19   :  { %637 = vst [vmem:[#allocation3 + $0xf0] sm:$0xf8] %v2551_v3  ;;  %638 = vst [vmem:[#allocation3 + $0xf8] sm:$0xf8] %v2551_v3  ;;  %155 = vmatprep.subr.mxu0 %v92_v43  ;;  %244 = vmatprep.subr.mxu1 %v94_v44  ;;  %v87_v49 = vld [vmem:[%s3966_s1 + $0x80] sm:$0xff]  ;;  %v89_v50 = vld [vmem:[%s3966_s1 + $0x90] sm:$0xff] }
  0x1a   :  { %639 = vst [vmem:[#allocation3 + $0x68] sm:$0xf8] %v2551_v3  ;;  %640 = vst [vmem:[#allocation3 + $0x190] sm:$0xf8] %v2551_v3  ;;  %156 = vmatpush1.msra.mxu0 %v91_v45  ;;  %245 = vmatpush1.msra.mxu1 %v93_v46  ;;  %v84_v51 = vld [vmem:[%s3966_s1 + $0x68] sm:$0xff]  ;;  %v86_v52 = vld [vmem:[%s3966_s1 + $0x78] sm:$0xff] }
  0x1b   :  { %641 = vst [vmem:[#allocation3 + $0x198] sm:$0xf8] %v2551_v3  ;;  %642 = vst [vmem:[#allocation3 + $0x38] sm:$0xf8] %v2551_v3  ;;  %157 = vmatprep.subr.mxu0 %v88_v47  ;;  %246 = vmatprep.subr.mxu1 %v90_v48  ;;  %v83_v53 = vld [vmem:[%s3966_s1 + $0x60] sm:$0xff]  ;;  %v85_v54 = vld [vmem:[%s3966_s1 + $0x70] sm:$0xff] }
  0x1c   :  { %643 = vst [vmem:[#allocation3 + $0x140] sm:$0xf8] %v2551_v3  ;;  %644 = vst [vmem:[#allocation3 + $0x1c0] sm:$0xf8] %v2551_v3  ;;  %158 = vmatpush1.msra.mxu0 %v87_v49  ;;  %247 = vmatpush1.msra.mxu1 %v89_v50  ;;  %v80_v55 = vld [vmem:[%s3966_s1 + $0x48] sm:$0xff]  ;;  %v82_v56 = vld [vmem:[%s3966_s1 + $0x58] sm:$0xff] }
  0x1d   :  { %645 = vst [vmem:[#allocation3 + $0xd8] sm:$0xf8] %v2551_v3  ;;  %646 = vst [vmem:[#allocation3 + $0x10] sm:$0xf8] %v2551_v3  ;;  %159 = vmatprep.subr.mxu0 %v84_v51  ;;  %248 = vmatprep.subr.mxu1 %v86_v52  ;;  %v79_v57 = vld [vmem:[%s3966_s1 + $0x40] sm:$0xff]  ;;  %v81_v58 = vld [vmem:[%s3966_s1 + $0x50] sm:$0xff] }
  0x1e   :  { %647 = vst [vmem:[#allocation3 + $0x58] sm:$0xf8] %v2551_v3  ;;  %648 = vst [vmem:[#allocation3 + $0x120] sm:$0xf8] %v2551_v3  ;;  %160 = vmatpush1.msra.mxu0 %v83_v53  ;;  %249 = vmatpush1.msra.mxu1 %v85_v54  ;;  %v76_v59 = vld [vmem:[%s3966_s1 + $0x28] sm:$0xff]  ;;  %v78_v60 = vld [vmem:[%s3966_s1 + $0x38] sm:$0xff] }
  0x1f   :  { %1911 = vst [vmem:[#allocation4 + $0x30] sm:$0x7] %v2551_v3  ;;  %1912 = vst [vmem:[#allocation4 + $0x50] sm:$0x7] %v2551_v3  ;;  %161 = vmatprep.subr.mxu0 %v80_v55  ;;  %250 = vmatprep.subr.mxu1 %v82_v56  ;;  %v75_v61 = vld [vmem:[%s3966_s1 + $0x20] sm:$0xff]  ;;  %v77_v62 = vld [vmem:[%s3966_s1 + $0x30] sm:$0xff] }
  0x20   :  { %1913 = vst [vmem:[#allocation4 + $0x40] sm:$0x7] %v2551_v3  ;;  %1915 = vst [vmem:[#allocation4 + $0x70] sm:$0x7] %v2551_v3  ;;  %162 = vmatpush1.msra.mxu0 %v79_v57  ;;  %251 = vmatpush1.msra.mxu1 %v81_v58  ;;  %v72_v63 = vld [vmem:[%s3966_s1 + $0x8] sm:$0xff]  ;;  %v73_v2 = vld [vmem:[%s3966_s1 + $0x10] sm:$0xff] }
  0x21   :  { %1916 = vst [vmem:[#allocation4 + $0x18] sm:$0x7] %v2551_v3  ;;  %1917 = vst [vmem:[#allocation4 + $0x8] sm:$0x7] %v2551_v3  ;;  %163 = vmatprep.subr.mxu0 %v76_v59  ;;  %252 = vmatprep.subr.mxu1 %v78_v60  ;;  %v947_v14 = vld [vmem:[%s3967_s4 + $0xf8] sm:$0xff]  ;;  %v946_v17 = vld [vmem:[%s3967_s4 + $0xf0] sm:$0xff] }
  0x22   :  { %1918 = vst [vmem:[#allocation4 + $0xa8] sm:$0xc0] %v2551_v3  ;;  %1919 = vst [vmem:[#allocation4 + $0x20] sm:$0xc0] %v2551_v3  ;;  %164 = vmatpush1.msra.mxu0 %v75_v61  ;;  %253 = vmatpush1.msra.mxu1 %v77_v62  ;;  %v979_v15 = vld [vmem:[%s3967_s4 + $0x1f8] sm:$0xff]  ;;  %v978_v18 = vld [vmem:[%s3967_s4 + $0x1f0] sm:$0xff] }
  0x23   :  { %1922 = vst [vmem:[#allocation4 + $0x58] sm:$0xff] %v2551_v3  ;;  %1925 = vst [vmem:[#allocation4 + $0xb0] sm:$0xff] %v2551_v3  ;;  %165 = vmatprep.subr.mxu0 %v72_v63  ;;  %v931_v16 = vld [vmem:[%s3967_s4 + $0x78] sm:$0xff]  ;;  %v930_v19 = vld [vmem:[%s3967_s4 + $0x70] sm:$0xff]  ;;  %vm795_vm6 = vcmask 1042432   ;;  %vm2175_vm7 = vcmask 385024  }
  0x24   :  { %1926 = vst [vmem:[#allocation4 + $0x28] sm:$0xc0] %v2551_v3  ;;  %1927 = vst [vmem:[#allocation4 + $0x98] sm:$0xc0] %v2551_v3  ;;  %v962_v20 = vld [vmem:[%s3967_s4 + $0x170] sm:$0xff]  ;;  %v945_v21 = vld [vmem:[%s3967_s4 + $0xe8] sm:$0xff] }
  0x25   :  { %1933 = vst [vmem:[#allocation4 + $0xa0] sm:$0xff] %v2551_v3  ;;  %36 = vst.msk [vmem:[#allocation2] sm:$0xff] %vm35_vm0, %v2604_v0  ;;  %v74_v0 = vld [vmem:[%s3966_s1 + $0x18] sm:$0xff]  ;;  %v977_v22 = vld [vmem:[%s3967_s4 + $0x1e8] sm:$0xff] }
  0x26   :  { %37 = vst.msk [vmem:[#allocation2 + $0x10] sm:$0xff] %vm35_vm0, %v2609_v1  ;;  %v71_v1 = vld [vmem:[%s3966_s1] sm:$0xff]  ;;  %254 = vmatprep.subr.mxu1 %v74_v0  ;;  %v929_v23 = vld [vmem:[%s3967_s4 + $0x68] sm:$0xff]  ;;  %v943_v29 = vld [vmem:[%s3967_s4 + $0xd8] sm:$0xff] }
  0x27   :  { %166 = vmatpush1.msra.mxu0 %v71_v1  ;;  %255 = vmatpush1.msra.mxu1 %v73_v2  ;;  %v961_v24 = vld [vmem:[%s3967_s4 + $0x168] sm:$0xff]  ;;  %v944_v25 = vld [vmem:[%s3967_s4 + $0xe0] sm:$0xff]  ;;  %v975_v30 = vld [vmem:[%s3967_s4 + $0x1d8] sm:$0xff] }
  0x28   :  { %2181 = vmatprep.subr.mxu0 %v947_v14  ;;  %2225 = vmatprep.subr.mxu1 %v979_v15  ;;  %v976_v26 = vld [vmem:[%s3967_s4 + $0x1e0] sm:$0xff]  ;;  %v927_v31 = vld [vmem:[%s3967_s4 + $0x58] sm:$0xff]  ;;  %v942_v33 = vld [vmem:[%s3967_s4 + $0xd0] sm:$0xff] }
  0x29   :  { %v928_v27 = vld [vmem:[%s3967_s4 + $0x60] sm:$0xff]  ;;  %v959_v32 = vld [vmem:[%s3967_s4 + $0x158] sm:$0xff]  ;;  %v974_v34 = vld [vmem:[%s3967_s4 + $0x1d0] sm:$0xff] }
  0x2a   :  { %v960_v28 = vld [vmem:[%s3967_s4 + $0x160] sm:$0xff]  ;;  %v926_v35 = vld [vmem:[%s3967_s4 + $0x50] sm:$0xff]  ;;  %v941_v37 = vld [vmem:[%s3967_s4 + $0xc8] sm:$0xff] }
  0x2b   :  { %v958_v36 = vld [vmem:[%s3967_s4 + $0x150] sm:$0xff]  ;;  %v973_v38 = vld [vmem:[%s3967_s4 + $0x1c8] sm:$0xff]  ;;  %v940_v41 = vld [vmem:[%s3967_s4 + $0xc0] sm:$0xff] }
  0x2c   :  { %v925_v39 = vld [vmem:[%s3967_s4 + $0x48] sm:$0xff]  ;;  %v972_v42 = vld [vmem:[%s3967_s4 + $0x1c0] sm:$0xff]  ;;  %v939_v45 = vld [vmem:[%s3967_s4 + $0xb8] sm:$0xff] }
  0x2d   :  { %v957_v40 = vld [vmem:[%s3967_s4 + $0x148] sm:$0xff]  ;;  %v924_v43 = vld [vmem:[%s3967_s4 + $0x40] sm:$0xff]  ;;  %v971_v46 = vld [vmem:[%s3967_s4 + $0x1b8] sm:$0xff] }
  0x2e   :  { %v956_v44 = vld [vmem:[%s3967_s4 + $0x140] sm:$0xff]  ;;  %v923_v47 = vld [vmem:[%s3967_s4 + $0x38] sm:$0xff]  ;;  %v938_v49 = vld [vmem:[%s3967_s4 + $0xb0] sm:$0xff] }
  0x2f   :  { %v955_v48 = vld [vmem:[%s3967_s4 + $0x138] sm:$0xff]  ;;  %v970_v50 = vld [vmem:[%s3967_s4 + $0x1b0] sm:$0xff]  ;;  %v937_v53 = vld [vmem:[%s3967_s4 + $0xa8] sm:$0xff] }
  0x30   :  { %v922_v51 = vld [vmem:[%s3967_s4 + $0x30] sm:$0xff]  ;;  %v969_v54 = vld [vmem:[%s3967_s4 + $0x1a8] sm:$0xff]  ;;  %v936_v57 = vld [vmem:[%s3967_s4 + $0xa0] sm:$0xff] }
  0x31   :  { %v954_v52 = vld [vmem:[%s3967_s4 + $0x130] sm:$0xff]  ;;  %v921_v55 = vld [vmem:[%s3967_s4 + $0x28] sm:$0xff]  ;;  %v968_v58 = vld [vmem:[%s3967_s4 + $0x1a0] sm:$0xff] }
  0x32   :  { %v953_v56 = vld [vmem:[%s3967_s4 + $0x128] sm:$0xff]  ;;  %v920_v59 = vld [vmem:[%s3967_s4 + $0x20] sm:$0xff]  ;;  %v935_v61 = vld [vmem:[%s3967_s4 + $0x98] sm:$0xff] }
  0x33   :  { %v952_v60 = vld [vmem:[%s3967_s4 + $0x120] sm:$0xff]  ;;  %v967_v62 = vld [vmem:[%s3967_s4 + $0x198] sm:$0xff]  ;;  %v934_v1 = vld [vmem:[%s3967_s4 + $0x90] sm:$0xff] }
  0x34   :  { %v919_v63 = vld [vmem:[%s3967_s4 + $0x18] sm:$0xff]  ;;  %v966_v2 = vld [vmem:[%s3967_s4 + $0x190] sm:$0xff] }
  0x35   :  { %v951_v0 = vld [vmem:[%s3967_s4 + $0x118] sm:$0xff] }
  0x36   :  { %v1011_v14 = vld [vmem:[%s3967_s4 + $0x2f8] sm:$0xff] }
  0x37   :  { %v1043_v15 = vld [vmem:[%s3967_s4 + $0x3f8] sm:$0xff] }
  0x74   :  { %v41_v4 = vpop.permute.xlu0 %40  ;;  %v59_v5 = vpop.permute.xlu1 %58 }
  0x75   :  { %47 = vst.msk [vmem:[#allocation2 + $0x1] sm:$0xff] %vm46_vm1, %v41_v4  ;;  %v918_v4 = vld [vmem:[%s3967_s4 + $0x10] sm:$0xff] }
  0x78   :  { %v50_v6 = vpop.permute.xlu0 %49  ;;  %v43_v7 = vpop.permute.xlu1 %42 }
  0x79   :  { %56 = vst.msk [vmem:[#allocation2 + $0x2] sm:$0xff] %vm55_vm2, %v50_v6  ;;  %v933_v6 = vld [vmem:[%s3967_s4 + $0x88] sm:$0xff] }
  0x7a   :  { %48 = vst.msk [vmem:[#allocation2 + $0x11] sm:$0xff] %vm46_vm1, %v43_v7  ;;  %v965_v7 = vld [vmem:[%s3967_s4 + $0x188] sm:$0xff] }
  0x7b   :  { %65 = vst.msk [vmem:[#allocation2 + $0x3] sm:$0xff] %vm64_vm3, %v59_v5  ;;  %v950_v5 = vld [vmem:[%s3967_s4 + $0x110] sm:$0xff] }
  0x7c   :  { %v52_v8 = vpop.permute.xlu0 %51  ;;  %v61_v9 = vpop.permute.xlu1 %60 }
  0x7d   :  { %57 = vst.msk [vmem:[#allocation2 + $0x12] sm:$0xff] %vm55_vm2, %v52_v8  ;;  %v917_v8 = vld [vmem:[%s3967_s4 + $0x8] sm:$0xff] }
  0x7e   :  { %66 = vst.msk [vmem:[#allocation2 + $0x13] sm:$0xff] %vm64_vm3, %v61_v9  ;;  %v949_v9 = vld [vmem:[%s3967_s4 + $0x108] sm:$0xff] }
  0x82   :  { %v67_v10 = vld [vmem:[#allocation2] sm:$0xff]  ;;  %v68_v11 = vld [vmem:[#allocation2 + $0x8] sm:$0xff] }
  0x83   :  { %200 = vmatmul.mubr.f32.vlgmr.msra.gmra.mxu0 %v67_v10  ;;  %289 = vmatmul.mubr.f32.vlgmr.msra.gmra.mxu1 %v67_v10  ;;  %v932_v10 = vld [vmem:[%s3967_s4 + $0x80] sm:$0xff] }
  0x84   :  { %205 = vmatprep.mubr.f32.mxu0 %v2551_v3  ;;  %294 = vmatprep.mubr.f32.mxu1 %v2551_v3 }
  0x85   :  { %v69_v12 = vld [vmem:[#allocation2 + $0x10] sm:$0xff]  ;;  %v70_v13 = vld [vmem:[#allocation2 + $0x18] sm:$0xff]  ;;  %2182 = vmatpush3.msra.mxu0 %v931_v16 }
  0x86   :  { %2183 = vmatprep.subr.mxu0 %v946_v17 }
  0x87   :  { %206 = vmatmul.mubr.f32.gmra.mxu0 %v68_v11  ;;  %295 = vmatmul.mubr.f32.gmra.mxu1 %v68_v11  ;;  %v964_v11 = vld [vmem:[%s3967_s4 + $0x180] sm:$0xff] }
  0x88   :  { %211 = vmatprep.mubr.f32.mxu0 %v2551_v3  ;;  %300 = vmatprep.mubr.f32.mxu1 %v2551_v3 }
  0x89   :  { %2184 = vmatpush3.msra.mxu0 %v930_v19 }
  0x8a   :  { %2185 = vmatprep.subr.mxu0 %v945_v21 }
  0x8b   :  { %212 = vmatmul.mubr.f32.gmra.mxu0 %v69_v12  ;;  %301 = vmatmul.mubr.f32.gmra.mxu1 %v69_v12  ;;  %v916_v12 = vld [vmem:[%s3967_s4] sm:$0xff] }
  0x8c   :  { %217 = vmatprep.mubr.f32.mxu0 %v2551_v3  ;;  %306 = vmatprep.mubr.f32.mxu1 %v2551_v3  ;;  %v963_v3 = vld [vmem:[%s3967_s4 + $0x178] sm:$0xff] }
  0x8d   :  { %2226 = vmatpush3.msra.mxu1 %v963_v3  ;;  %2186 = vmatpush3.msra.mxu0 %v929_v23 }
  0x8e   :  { %2227 = vmatprep.subr.mxu1 %v978_v18  ;;  %2187 = vmatprep.subr.mxu0 %v944_v25 }
  0x8f   :  { %218 = vmatmul.mubr.f32.gmra.mxu0 %v70_v13  ;;  %307 = vmatmul.mubr.f32.gmra.mxu1 %v70_v13  ;;  %v948_v13 = vld [vmem:[%s3967_s4 + $0x100] sm:$0xff] }
  0x90   :  { %2228 = vmatpush3.msra.mxu1 %v962_v20  ;;  %2188 = vmatpush3.msra.mxu0 %v928_v27 }
  0x91   :  { %2229 = vmatprep.subr.mxu1 %v977_v22  ;;  %2189 = vmatprep.subr.mxu0 %v943_v29 }
  0x92   :  { %2230 = vmatpush3.msra.mxu1 %v961_v24  ;;  %2190 = vmatpush3.msra.mxu0 %v927_v31 }
  0x93   :  { %2231 = vmatprep.subr.mxu1 %v976_v26  ;;  %2191 = vmatprep.subr.mxu0 %v942_v33 }
  0x94   :  { %2232 = vmatpush3.msra.mxu1 %v960_v28  ;;  %2192 = vmatpush3.msra.mxu0 %v926_v35 }
  0x95   :  { %2233 = vmatprep.subr.mxu1 %v975_v30  ;;  %2193 = vmatprep.subr.mxu0 %v941_v37 }
  0x96   :  { %2234 = vmatpush3.msra.mxu1 %v959_v32  ;;  %2194 = vmatpush3.msra.mxu0 %v925_v39 }
  0x97   :  { %2235 = vmatprep.subr.mxu1 %v974_v34  ;;  %2195 = vmatprep.subr.mxu0 %v940_v41 }
  0x98   :  { %2236 = vmatpush3.msra.mxu1 %v958_v36  ;;  %2196 = vmatpush3.msra.mxu0 %v924_v43 }
  0x99   :  { %2237 = vmatprep.subr.mxu1 %v973_v38  ;;  %2197 = vmatprep.subr.mxu0 %v939_v45 }
  0x9a   :  { %2238 = vmatpush3.msra.mxu1 %v957_v40  ;;  %2198 = vmatpush3.msra.mxu0 %v923_v47 }
  0x9b   :  { %2239 = vmatprep.subr.mxu1 %v972_v42  ;;  %2199 = vmatprep.subr.mxu0 %v938_v49 }
  0x9c   :  { %2240 = vmatpush3.msra.mxu1 %v956_v44  ;;  %2200 = vmatpush3.msra.mxu0 %v922_v51 }
  0x9d   :  { %2241 = vmatprep.subr.mxu1 %v971_v46  ;;  %2201 = vmatprep.subr.mxu0 %v937_v53 }
  0x9e   :  { %2242 = vmatpush3.msra.mxu1 %v955_v48  ;;  %2202 = vmatpush3.msra.mxu0 %v921_v55 }
  0x9f   :  { %2243 = vmatprep.subr.mxu1 %v970_v50  ;;  %2203 = vmatprep.subr.mxu0 %v936_v57 }
  0xa0   :  { %2244 = vmatpush3.msra.mxu1 %v954_v52  ;;  %2204 = vmatpush3.msra.mxu0 %v920_v59 }
  0xa1   :  { %2245 = vmatprep.subr.mxu1 %v969_v54  ;;  %2205 = vmatprep.subr.mxu0 %v935_v61 }
  0xa2   :  { %2246 = vmatpush3.msra.mxu1 %v953_v56  ;;  %2206 = vmatpush3.msra.mxu0 %v919_v63 }
  0xa3   :  { %2247 = vmatprep.subr.mxu1 %v968_v58  ;;  %2207 = vmatprep.subr.mxu0 %v934_v1 }
  0xa4   :  { %2248 = vmatpush3.msra.mxu1 %v952_v60  ;;  %2208 = vmatpush3.msra.mxu0 %v918_v4 }
  0xa5   :  { %2249 = vmatprep.subr.mxu1 %v967_v62  ;;  %2209 = vmatprep.subr.mxu0 %v933_v6 }
  0xa6   :  { %2250 = vmatpush3.msra.mxu1 %v951_v0  ;;  %2210 = vmatpush3.msra.mxu0 %v917_v8 }
  0xa7   :  { %2251 = vmatprep.subr.mxu1 %v966_v2  ;;  %2211 = vmatprep.subr.mxu0 %v932_v10 }
  0xa8   :  { %2252 = vmatpush3.msra.mxu1 %v950_v5  ;;  %2212 = vmatpush3.msra.mxu0 %v916_v12 }
  0xa9   :  { %2253 = vmatprep.subr.mxu1 %v965_v7  ;;  %2269 = vmatprep.subr.mxu0 %v1011_v14 }
  0xaa   :  { %2254 = vmatpush3.msra.mxu1 %v949_v9 }
  0xab   :  { %2255 = vmatprep.subr.mxu1 %v964_v11 }
  0xac   :  { %2256 = vmatpush3.msra.mxu1 %v948_v13 }
  0xad   :  { %2313 = vmatprep.subr.mxu1 %v1043_v15 }
 0x143   :  { %v3097_v16 = vpop.f32.mrf.mxu0  ;;  %v3099_v3 = vpop.f32.mrf.mxu1 }
 0x144   :  { %v353_v25 = vmul.f32 %v3097_v16, %v3097_v16  ;;  %v355_v27 = vmul.f32 %v3099_v3, %v3099_v3 }
 0x145   :  { %v3101_v17 = vpop.f32.mrf.mxu0  ;;  %v3103_v18 = vpop.f32.mrf.mxu1 }
 0x146   :  { %v354_v28 = vmul.f32 %v3101_v17, %v3101_v17  ;;  %v356_v29 = vmul.f32 %v3103_v18, %v3103_v18 }
 0x147   :  { %v3105_v19 = vpop.f32.mrf.mxu0  ;;  %v3107_v20 = vpop.f32.mrf.mxu1 }
 0x148   :  { %v357_v21 = vmul.f32 %v3105_v19, %v3105_v19  ;;  %v359_v22 = vmul.f32 %v3107_v20, %v3107_v20  ;;  %v313_v33 = vadd.f32 %v3105_v19, %v3097_v16  ;;  %v331_v35 = vadd.f32 %v3107_v20, %v3099_v3 }
 0x149   :  { %v3113_v23 = vpop.f32.mrf.mxu0  ;;  %v3115_v24 = vpop.f32.mrf.mxu1 }
 0x14a   :  { %v358_v26 = vmul.f32 %v3113_v23, %v3113_v23  ;;  %v360_v30 = vmul.f32 %v3115_v24, %v3115_v24  ;;  %v369_v34 = vadd.f32 %v357_v21, %v353_v25  ;;  %v387_v37 = vadd.f32 %v359_v22, %v355_v27 }
 0x14b   :  { %v3129_v31 = vpop.f32.mrf.mxu0  ;;  %v3131_v32 = vpop.f32.mrf.mxu1  ;;  %v322_v38 = vadd.f32 %v3113_v23, %v3101_v17  ;;  %v340_v39 = vadd.f32 %v3115_v24, %v3103_v18 }
 0x14c   :  { %v361_v36 = vmul.f32 %v3129_v31, %v3129_v31  ;;  %v363_v40 = vmul.f32 %v3131_v32, %v3131_v32  ;;  %v378_v43 = vadd.f32 %v358_v26, %v354_v28  ;;  %v314_v44 = vadd.f32 %v313_v33, %v3129_v31 }
 0x14d   :  { %v3145_v41 = vpop.f32.mrf.mxu0  ;;  %v3147_v42 = vpop.f32.mrf.mxu1  ;;  %v332_v45 = vadd.f32 %v331_v35, %v3131_v32  ;;  %v396_v47 = vadd.f32 %v360_v30, %v356_v29 }
 0x14e   :  { %v362_v46 = vmul.f32 %v3145_v41, %v3145_v41  ;;  %v370_v48 = vadd.f32 %v369_v34, %v361_v36  ;;  %v323_v49 = vadd.f32 %v322_v38, %v3145_v41  ;;  %v364_v50 = vmul.f32 %v3147_v42, %v3147_v42 }
 0x14f   :  { %v3156_v51 = vpop.f32.mrf.mxu0  ;;  %v3158_v52 = vpop.f32.mrf.mxu1  ;;  %v341_v53 = vadd.f32 %v340_v39, %v3147_v42  ;;  %v388_v57 = vadd.f32 %v387_v37, %v363_v40 }
 0x150   :  { %v315_v54 = vadd.f32 %v314_v44, %v3156_v51  ;;  %v365_v55 = vmul.f32 %v3156_v51, %v3156_v51  ;;  %v333_v56 = vadd.f32 %v332_v45, %v3158_v52  ;;  %v379_v58 = vadd.f32 %v378_v43, %v362_v46 }
 0x151   :  { %v397_v59 = vadd.f32 %v396_v47, %v364_v50  ;;  %v367_v60 = vmul.f32 %v3158_v52, %v3158_v52  ;;  %v3167_v61 = vpop.f32.mrf.mxu0  ;;  %v3169_v62 = vpop.f32.mrf.mxu1 }
 0x152   :  { %v316_v63 = vrot.slane %v315_v54, 4  ;;  %v371_v0 = vadd.f32 %v370_v48, %v365_v55  ;;  %v334_v1 = vrot.slane %v333_v56, 4  ;;  %v324_v2 = vadd.f32 %v323_v49, %v3167_v61 }
 0x153   :  { %v389_v4 = vadd.f32 %v388_v57, %v367_v60  ;;  %v366_v5 = vmul.f32 %v3167_v61, %v3167_v61  ;;  %v342_v6 = vadd.f32 %v341_v53, %v3169_v62  ;;  %v368_v7 = vmul.f32 %v3169_v62, %v3169_v62 }
 0x154   :  { %v317_v8 = vadd.f32 %v316_v63, %v315_v54  ;;  %v372_v9 = vrot.slane %v371_v0, 4  ;;  %v335_v10 = vadd.f32 %v334_v1, %v333_v56  ;;  %v325_v11 = vrot.slane %v324_v2, 4 }
 0x155   :  { %v390_v12 = vrot.slane %v389_v4, 4  ;;  %v380_v13 = vadd.f32 %v379_v58, %v366_v5  ;;  %v343_v14 = vrot.slane %v342_v6, 4  ;;  %v398_v15 = vadd.f32 %v397_v59, %v368_v7 }
 0x156   :  { %v318_v21 = vrot.slane %v317_v8, 2  ;;  %v373_v22 = vadd.f32 %v372_v9, %v371_v0  ;;  %v336_v25 = vrot.slane %v335_v10, 2  ;;  %v326_v26 = vadd.f32 %v325_v11, %v324_v2 }
 0x157   :  { %v391_v27 = vadd.f32 %v390_v12, %v389_v4  ;;  %v381_v28 = vrot.slane %v380_v13, 4  ;;  %v344_v29 = vadd.f32 %v343_v14, %v342_v6  ;;  %v399_v30 = vrot.slane %v398_v15, 4 }
 0x158   :  { %v319_v33 = vadd.f32 %v318_v21, %v317_v8  ;;  %v374_v34 = vrot.slane %v373_v22, 2  ;;  %v337_v35 = vadd.f32 %v336_v25, %v335_v10  ;;  %v327_v36 = vrot.slane %v326_v26, 2 }
 0x159   :  { %v392_v37 = vrot.slane %v391_v27, 2  ;;  %v382_v38 = vadd.f32 %v381_v28, %v380_v13  ;;  %v345_v39 = vrot.slane %v344_v29, 2  ;;  %v400_v40 = vadd.f32 %v399_v30, %v398_v15 }
 0x15a   :  { %v320_v43 = vrot.slane %v319_v33, 1  ;;  %v375_v44 = vadd.f32 %v374_v34, %v373_v22  ;;  %v338_v45 = vrot.slane %v337_v35, 1  ;;  %v328_v46 = vadd.f32 %v327_v36, %v326_v26 }
 0x15b   :  { %v393_v47 = vadd.f32 %v392_v37, %v391_v27  ;;  %v383_v48 = vrot.slane %v382_v38, 2  ;;  %v346_v49 = vadd.f32 %v345_v39, %v344_v29  ;;  %v401_v50 = vrot.slane %v400_v40, 2 }
 0x15c   :  { %v321_v53 = vadd.f32 %v320_v43, %v319_v33  ;;  %v376_v54 = vrot.slane %v375_v44, 1  ;;  %v339_v55 = vadd.f32 %v338_v45, %v337_v35  ;;  %v329_v56 = vrot.slane %v328_v46, 1 }
 0x15d   :  { %v394_v57 = vrot.slane %v393_v47, 1  ;;  %v384_v58 = vadd.f32 %v383_v48, %v382_v38  ;;  %v347_v59 = vrot.slane %v346_v49, 1  ;;  %v402_v60 = vadd.f32 %v401_v50, %v400_v40 }
 0x15e   :  { %v3177_v63 = vmul.f32 0.045454547, %v321_v53  ;;  %v377_v0 = vadd.f32 %v376_v54, %v375_v44  ;;  %v3179_v1 = vmul.f32 0.045454547, %v339_v55  ;;  %v330_v2 = vadd.f32 %v329_v56, %v328_v46 }
 0x15f   :  { %v395_v4 = vadd.f32 %v394_v57, %v393_v47  ;;  %v385_v5 = vrot.slane %v384_v58, 1  ;;  %v348_v6 = vadd.f32 %v347_v59, %v346_v49  ;;  %v403_v7 = vrot.slane %v402_v60, 1 }
 0x160   :  { %v405_v8 = vmul.f32 0.045454547, %v377_v0  ;;  %v409_v9 = vmul.f32 %v3177_v63, %v3177_v63  ;;  %v411_v10 = vmul.f32 %v3179_v1, %v3179_v1  ;;  %v350_v11 = vmul.f32 0.045454547, %v330_v2 }
 0x161   :  { %v407_v12 = vmul.f32 0.045454547, %v395_v4  ;;  %v386_v13 = vadd.f32 %v385_v5, %v384_v58  ;;  %v352_v14 = vmul.f32 0.045454547, %v348_v6  ;;  %v404_v15 = vadd.f32 %v403_v7, %v402_v60  ;;  %v421_v60 = vld [vmem:[%s3968_s2] sm:$0xf] }
 0x162   :  { %v413_v21 = vsub.f32 %v405_v8, %v409_v9  ;;  %v410_v22 = vmul.f32 %v350_v11, %v350_v11  ;;  %v2555_v43 = vmov 1966171168   ;;  %v439_v45 = vlaneseq }
 0x163   :  { %v415_v25 = vsub.f32 %v407_v12, %v411_v10  ;;  %v406_v26 = vmul.f32 0.045454547, %v386_v13  ;;  %v408_v27 = vmul.f32 0.045454547, %v404_v15  ;;  %v412_v28 = vmul.f32 %v352_v14, %v352_v14 }
 0x164   :  { %v417_v29 = vmax.f32 %v413_v21, 0.0  ;;  %v437_v44 = vunpack.c.l.s4 %v2555_v43  ;;  %v440_v47 = vshrl.u32 %v439_v45, 7 }
 0x165   :  { %v419_v30 = vmax.f32 %v415_v25, 0.0  ;;  %v414_v33 = vsub.f32 %v406_v26, %v410_v22  ;;  %v416_v34 = vsub.f32 %v408_v27, %v412_v28 }
 0x166   :  { %v422_v35 = vadd.f32 1e-05, %v417_v29  ;;  %v438_v46 = vunpack.c.0.s8 %v437_v44  ;;  %v3188_v0 = vsub.s32 0, %v440_v47  ;;  %v3190_v4 = vsub.s32 1, %v440_v47 }
 0x167   :  { %v424_v36 = vadd.f32 1e-05, %v419_v30  ;;  %v418_v37 = vmax.f32 %v414_v33, 0.0  ;;  %v420_v38 = vmax.f32 %v416_v34, 0.0  ;;  %v3192_v5 = vsub.s32 2, %v440_v47 }
 0x168   :  { %2538 = vrsqrt.f32 %v422_v35  ;;  %v441_v50 = vsub.s32 %v438_v46, %v440_v47  ;;  %v3194_v6 = vsub.s32 3, %v440_v47  ;;  %v460_v30 = vld [vmem:[%s3969_s3] sm:$0xf] }
 0x169   :  { %v423_v39 = vadd.f32 1e-05, %v418_v37  ;;  %v425_v40 = vadd.f32 1e-05, %v420_v38  ;;  %2540 = vrsqrt.f32 %v424_v36  ;;  %3977 = vst [vmem:[#allocation5_spill] sm:$0xff] %v3192_v5 }
 0x16b   :  { %2542 = vrsqrt.f32 %v423_v39 }
 0x16c   :  { %2544 = vrsqrt.f32 %v425_v40 }
 0x175   :  { %v2539_v48 = vpop.eup %2538 }
 0x176   :  { %v2541_v49 = vpop.eup %2540 }
 0x178   :  { %v2543_v53 = vpop.eup %2542 }
 0x179   :  { %v2545_v54 = vpop.eup %2544  ;;  %v434_v55 = vcombine.low %v2539_v48, %v2543_v53 }
 0x17a   :  { %v435_v56 = vcombine.low %v2541_v49, %v2545_v54 }
 0x17b   :  { %v442_v57 = vrot.slane %v434_v55, %v441_v50 }
 0x17c   :  { %v449_v58 = vrot.slane %v435_v56, %v441_v50 }
 0x17e   :  { %v450_v59 = vcombine.low %v442_v57, %v449_v58 }
 0x180   :  { %v457_v2 = vrot.slane %v450_v59, %v441_v50 }
 0x182   :  { %v459_v7 = vmul.f32 %v457_v2, %v421_v60 }
 0x184   :  { %v465_v8 = vrot.slane %v459_v7, %v3188_v0  ;;  %v469_v9 = vrot.slane %v459_v7, %v3190_v4  ;;  %v473_v10 = vrot.slane %v459_v7, %v3192_v5  ;;  %v477_v12 = vrot.slane %v459_v7, %v3194_v6 }
 0x186   :  { %v482_v13 = vmul.f32 %v465_v8, %v3177_v63  ;;  %v483_v15 = vmul.f32 %v469_v9, %v350_v11  ;;  %v484_v21 = vmul.f32 %v473_v10, %v3179_v1  ;;  %v485_v22 = vmul.f32 %v477_v12, %v352_v14 }
 0x187   :  { %v516_v34 = vmul.f32 %v465_v8, %v3097_v16  ;;  %v517_v35 = vmul.f32 %v469_v9, %v3101_v17  ;;  %v518_v63 = vmul.f32 %v473_v10, %v3099_v3  ;;  %v519_v11 = vmul.f32 %v477_v12, %v3103_v18 }
 0x188   :  { %v490_v25 = vcombine.low %v482_v13, %v483_v15  ;;  %v491_v26 = vcombine.low %v484_v21, %v485_v22  ;;  %v520_v1 = vmul.f32 %v465_v8, %v3105_v19  ;;  %v521_v36 = vmul.f32 %v469_v9, %v3113_v23  ;;  %v1010_v21 = vld [vmem:[%s3967_s4 + $0x2f0] sm:$0xff] }
 0x189   :  { %v522_v37 = vmul.f32 %v473_v10, %v3107_v20  ;;  %v523_v38 = vmul.f32 %v477_v12, %v3115_v24  ;;  %v524_v39 = vmul.f32 %v465_v8, %v3129_v31  ;;  %v525_v40 = vmul.f32 %v469_v9, %v3145_v41  ;;  %v1042_v22 = vld [vmem:[%s3967_s4 + $0x3f0] sm:$0xff] }
 0x18a   :  { %v498_v27 = vrot.slane %v490_v25, %v441_v50  ;;  %v505_v28 = vrot.slane %v491_v26, %v441_v50  ;;  %v526_v16 = vmul.f32 %v473_v10, %v3131_v32  ;;  %v527_v17 = vmul.f32 %v477_v12, %v3147_v42 }
 0x18b   :  { %v528_v20 = vmul.f32 %v465_v8, %v3156_v51  ;;  %v529_v24 = vmul.f32 %v469_v9, %v3167_v61  ;;  %v530_v31 = vmul.f32 %v473_v10, %v3158_v52  ;;  %v531_v41 = vmul.f32 %v477_v12, %v3169_v62  ;;  %v995_v8 = vld [vmem:[%s3967_s4 + $0x278] sm:$0xff] }
 0x18c   :  { %v506_v29 = vcombine.low %v498_v27, %v505_v28  ;;  %v1027_v9 = vld [vmem:[%s3967_s4 + $0x378] sm:$0xff] }
 0x18e   :  { %v513_v33 = vrot.slane %v506_v29, %v441_v50  ;;  %v994_v29 = vld [vmem:[%s3967_s4 + $0x270] sm:$0xff] }
 0x190   :  { %v515_v14 = vsub.f32 %v460_v30, %v513_v33  ;;  %v1026_v30 = vld [vmem:[%s3967_s4 + $0x370] sm:$0xff] }
 0x192   :  { %v536_v3 = vrot.slane %v515_v14, %v3188_v0  ;;  %v540_v18 = vrot.slane %v515_v14, %v3190_v4  ;;  %v544_v19 = vrot.slane %v515_v14, %v3192_v5  ;;  %v548_v23 = vrot.slane %v515_v14, %v3194_v6 }
 0x194   :  { %v553_v32 = vadd.f32 %v536_v3, %v516_v34  ;;  %v554_v43 = vadd.f32 %v540_v18, %v517_v35  ;;  %v555_v42 = vadd.f32 %v544_v19, %v518_v63  ;;  %v556_v44 = vadd.f32 %v548_v23, %v519_v11  ;;  %v1009_v11 = vld [vmem:[%s3967_s4 + $0x2e8] sm:$0xff] }
 0x195   :  { %v557_v45 = vadd.f32 %v536_v3, %v520_v1  ;;  %v558_v46 = vadd.f32 %v540_v18, %v521_v36  ;;  %v559_v47 = vadd.f32 %v544_v19, %v522_v37  ;;  %v560_v48 = vadd.f32 %v548_v23, %v523_v38  ;;  %v1041_v1 = vld [vmem:[%s3967_s4 + $0x3e8] sm:$0xff] }
 0x196   :  { %v561_v49 = vadd.f32 %v536_v3, %v524_v39  ;;  %v562_v50 = vadd.f32 %v540_v18, %v525_v40  ;;  %v563_v51 = vadd.f32 %v544_v19, %v526_v16  ;;  %v564_v53 = vadd.f32 %v548_v23, %v527_v17  ;;  %v993_v39 = vld [vmem:[%s3967_s4 + $0x268] sm:$0xff] }
 0x197   :  { %v565_v61 = vadd.f32 %v536_v3, %v528_v20  ;;  %v566_v54 = vadd.f32 %v540_v18, %v529_v24  ;;  %v567_v52 = vadd.f32 %v544_v19, %v530_v31  ;;  %v568_v55 = vadd.f32 %v548_v23, %v531_v41  ;;  %v1025_v40 = vld [vmem:[%s3967_s4 + $0x368] sm:$0xff]  ;;  %v1008_v19 = vld [vmem:[%s3967_s4 + $0x2e0] sm:$0xff] }
 0x198   :  { %v3225_v62 = vmax.f32 %v553_v32, 0.0  ;;  %v3227_v56 = vmax.f32 %v554_v43, 0.0  ;;  %v3229_v57 = vmax.f32 %v555_v42, 0.0  ;;  %v3231_v58 = vmax.f32 %v556_v44, 0.0  ;;  %v1040_v23 = vld [vmem:[%s3967_s4 + $0x3e0] sm:$0xff] }
 0x199   :  { %v3233_v59 = vmax.f32 %v557_v45, 0.0  ;;  %v3235_v60 = vmax.f32 %v558_v46, 0.0  ;;  %v3237_v2 = vmax.f32 %v559_v47, 0.0  ;;  %v3239_v7 = vmax.f32 %v560_v48, 0.0  ;;  %v992_v32 = vld [vmem:[%s3967_s4 + $0x260] sm:$0xff] }
 0x19a   :  { %v3247_v10 = vmax.f32 %v561_v49, 0.0  ;;  %v3249_v12 = vmax.f32 %v562_v50, 0.0  ;;  %v3251_v13 = vmax.f32 %v563_v51, 0.0  ;;  %v3253_v15 = vmax.f32 %v564_v53, 0.0  ;;  %1236 = vmatprep.mubr.f32.mxu0 %v3227_v56  ;;  %1321 = vmatprep.mubr.f32.mxu1 %v3231_v58  ;;  %v1024_v43 = vld [vmem:[%s3967_s4 + $0x360] sm:$0xff] }
 0x19b   :  { %v3263_v25 = vmax.f32 %v565_v61, 0.0  ;;  %v3265_v26 = vmax.f32 %v566_v54, 0.0  ;;  %v3267_v27 = vmax.f32 %v567_v52, 0.0  ;;  %v3269_v28 = vmax.f32 %v568_v55, 0.0  ;;  %656 = vst [vmem:[#allocation3 + $0x148] sm:$0x7] %v3239_v7  ;;  %1237 = vmatmul.mubr.f32.vlgmr.msra.gmra.mxu0 %v3225_v62  ;;  %1322 = vmatmul.mubr.f32.vlgmr.msra.gmra.mxu1 %v3229_v57 }
 0x19c   :  { %653 = vst [vmem:[#allocation3 + $0xc8] sm:$0x7] %v3233_v59  ;;  %654 = vst [vmem:[#allocation3 + $0x1d0] sm:$0x7] %v3235_v60  ;;  %v685_v33 = vrot.slane %v3231_v58, 7  ;;  %v692_v34 = vrot.slane %v3239_v7, 7  ;;  %2270 = vmatpush3.msra.mxu0 %v995_v8  ;;  %2314 = vmatpush3.msra.mxu1 %v1027_v9 }
 0x19d   :  { %655 = vst [vmem:[#allocation3 + $0x80] sm:$0x7] %v3237_v2  ;;  %v697_v35 = vrot.slane %v3253_v15, 7  ;;  %v742_v63 = vrot.slane %v3231_v58, 6  ;;  %664 = vst [vmem:[#allocation3 + $0x1c8] sm:$0x7] %v3269_v28  ;;  %2271 = vmatprep.subr.mxu0 %v1010_v21  ;;  %2315 = vmatprep.subr.mxu1 %v1042_v22 }
 0x19e   :  { %v704_v14 = vrot.slane %v3269_v28, 7  ;;  %v749_v36 = vrot.slane %v3239_v7, 6  ;;  %v754_v37 = vrot.slane %v3253_v15, 6  ;;  %v761_v38 = vrot.slane %v3269_v28, 6  ;;  %661 = vst [vmem:[#allocation3 + $0x138] sm:$0x7] %v3263_v25  ;;  %2272 = vmatpush3.msra.mxu0 %v994_v29  ;;  %2316 = vmatpush3.msra.mxu1 %v1026_v30 }
 0x19f   :  { %662 = vst [vmem:[#allocation3 + $0x108] sm:$0x7] %v3265_v26  ;;  %663 = vst [vmem:[#allocation3 + $0x128] sm:$0x7] %v3267_v27  ;;  %v693_v16 = vsel %vm681_vm4, %v685_v33, %v692_v34  ;;  %v799_v17 = vrot.slane %v3231_v58, 5  ;;  %v806_v3 = vrot.slane %v3239_v7, 5  ;;  %2273 = vmatprep.subr.mxu0 %v1009_v11  ;;  %2317 = vmatprep.subr.mxu1 %v1041_v1 }
 0x1a0   :  { %725 = vst [vmem:[#allocation3 + $0x48] sm:$0xfe] %v685_v33  ;;  %733 = vst [vmem:[#allocation3 + $0x28] sm:$0xfe] %v697_v35  ;;  %v811_v18 = vrot.slane %v3253_v15, 5  ;;  %v705_v20 = vsel %vm681_vm4, %v697_v35, %v704_v14  ;;  %v750_v24 = vsel %vm738_vm5, %v742_v63, %v749_v36  ;;  %v762_v31 = vsel %vm738_vm5, %v754_v37, %v761_v38  ;;  %v1007_v7 = vld [vmem:[%s3967_s4 + $0x2d8] sm:$0xff] }
 0x1a1   :  { %782 = vst [vmem:[#allocation3 + $0x118] sm:$0xfc] %v742_v63  ;;  %790 = vst [vmem:[#allocation3 + $0x30] sm:$0xfc] %v754_v37  ;;  %v818_v41 = vrot.slane %v3269_v28, 5  ;;  %v807_v42 = vsel %vm795_vm6, %v799_v17, %v806_v3  ;;  %2274 = vmatpush3.msra.mxu0 %v993_v39  ;;  %2318 = vmatpush3.msra.mxu1 %v1025_v40  ;;  %v683_v44 = vrot.slane %v3227_v56, 7 }
 0x1a2   :  { %729 = vst [vmem:[#allocation3 + $0xa8] sm:$0xf] %v693_v16  ;;  %737 = vst [vmem:[#allocation3 + $0x190] sm:$0xf] %v705_v20  ;;  %v682_v45 = vrot.slane %v3225_v62, 7  ;;  %v684_v46 = vrot.slane %v3229_v57, 7  ;;  %2275 = vmatprep.subr.mxu0 %v1008_v19  ;;  %2319 = vmatprep.subr.mxu1 %v1040_v23 }
 0x1a3   :  { %794 = vst [vmem:[#allocation3 + $0x1c0] sm:$0x1f] %v762_v31  ;;  %839 = vst [vmem:[#allocation3 + $0x60] sm:$0xf8] %v799_v17  ;;  %v819_v47 = vsel %vm795_vm6, %v811_v18, %v818_v41  ;;  %v688_v48 = vrot.slane %v3235_v60, 7  ;;  %v686_v49 = vrot.slane %v3233_v59, 7  ;;  %2276 = vmatpush3.msra.mxu0 %v992_v32  ;;  %2320 = vmatpush3.msra.mxu1 %v1024_v43 }
 0x1a4   :  { %847 = vst [vmem:[#allocation3 + $0x8] sm:$0xf8] %v811_v18  ;;  %786 = vst [vmem:[#allocation3 + $0x78] sm:$0x1f] %v750_v24  ;;  %v690_v50 = vrot.slane %v3237_v2, 7  ;;  %v869_v51 = vld [vmem:[#allocation3 + $0x1d0] sm:$0xff]  ;;  %2277 = vmatprep.subr.mxu0 %v1007_v7 }
 0x1a5   :  { %843 = vst [vmem:[#allocation3 + $0x150] sm:$0x3f] %v807_v42  ;;  %851 = vst [vmem:[#allocation3 + $0x120] sm:$0x3f] %v819_v47  ;;  %v871_v53 = vld [vmem:[#allocation3 + $0x148] sm:$0xff]  ;;  %v695_v54 = vrot.slane %v3249_v12, 7  ;;  %1241 = vmatprep.mubr.f32.mxu0 %v869_v51  ;;  %v689_v9 = vsel %vm681_vm4, %v683_v44, %v688_v48  ;;  %v687_v21 = vsel %vm681_vm4, %v682_v45, %v686_v49 }
 0x1a6   :  { %v868_v61 = vld [vmem:[#allocation3 + $0xc8] sm:$0xff]  ;;  %723 = vst [vmem:[#allocation3 + $0xe8] sm:$0xfe] %v683_v44  ;;  %722 = vst [vmem:[#allocation3 + $0x50] sm:$0xfe] %v682_v45  ;;  %v694_v52 = vrot.slane %v3247_v10, 7  ;;  %1326 = vmatprep.mubr.f32.mxu1 %v871_v53  ;;  %v691_v22 = vsel %vm681_vm4, %v684_v46, %v690_v50 }
 0x1a7   :  { %724 = vst [vmem:[#allocation3 + $0xb0] sm:$0xfe] %v684_v46  ;;  %v696_v55 = vrot.slane %v3251_v13, 7  ;;  %v870_v58 = vld [vmem:[#allocation3 + $0x80] sm:$0xff]  ;;  %v1039_v8 = vld [vmem:[%s3967_s4 + $0x3d8] sm:$0xff]  ;;  %v700_v28 = vrot.slane %v3265_v26, 7  ;;  %1242 = vmatmul.mubr.f32.gmra.mxu0 %v868_v61 }
 0x1a8   :  { %1327 = vmatmul.mubr.f32.gmra.mxu1 %v870_v58  ;;  %v991_v29 = vld [vmem:[%s3967_s4 + $0x258] sm:$0xff]  ;;  %727 = vst [vmem:[#allocation3 + $0x1f8] sm:$0xf] %v689_v9  ;;  %726 = vst [vmem:[#allocation3 + $0x40] sm:$0xf] %v687_v21  ;;  %v698_v33 = vrot.slane %v3263_v25, 7  ;;  %1246 = vmatprep.mubr.f32.mxu0 %v3249_v12 }
 0x1a9   :  { %v1023_v30 = vld [vmem:[%s3967_s4 + $0x358] sm:$0xff]  ;;  %728 = vst [vmem:[#allocation3 + $0x20] sm:$0xf] %v691_v22  ;;  %731 = vst [vmem:[#allocation3 + $0x1a8] sm:$0xfe] %v695_v54  ;;  %v702_v34 = vrot.slane %v3267_v27, 7  ;;  %1331 = vmatprep.mubr.f32.mxu1 %v3253_v15  ;;  %v701_v63 = vsel %vm681_vm4, %v695_v54, %v700_v28  ;;  %2321 = vmatprep.subr.mxu1 %v1039_v8 }
 0x1aa   :  { %730 = vst [vmem:[#allocation3 + $0x100] sm:$0xfe] %v694_v52  ;;  %732 = vst [vmem:[#allocation3 + $0x1b8] sm:$0xfe] %v696_v55  ;;  %v740_v35 = vrot.slane %v3227_v56, 6  ;;  %v739_v11 = vrot.slane %v3225_v62, 6  ;;  %v699_v36 = vsel %vm681_vm4, %v694_v52, %v698_v33  ;;  %2278 = vmatpush3.msra.mxu0 %v991_v29  ;;  %2322 = vmatpush3.msra.mxu1 %v1023_v30 }
 0x1ab   :  { %v741_v1 = vrot.slane %v3229_v57, 6  ;;  %v745_v14 = vrot.slane %v3235_v60, 6  ;;  %735 = vst [vmem:[#allocation3 + $0xf8] sm:$0xf] %v701_v63  ;;  %v703_v37 = vsel %vm681_vm4, %v696_v55, %v702_v34  ;;  %v743_v38 = vrot.slane %v3233_v59, 6  ;;  %v1006_v39 = vld [vmem:[%s3967_s4 + $0x2d0] sm:$0xff]  ;;  %1247 = vmatmul.mubr.f32.gmra.mxu0 %v3247_v10 }
 0x1ac   :  { %780 = vst [vmem:[#allocation3 + $0x90] sm:$0xfc] %v740_v35  ;;  %v747_v15 = vrot.slane %v3237_v2, 6  ;;  %v1038_v40 = vld [vmem:[%s3967_s4 + $0x3d0] sm:$0xff]  ;;  %734 = vst [vmem:[#allocation3 + $0xf0] sm:$0xf] %v699_v36  ;;  %1332 = vmatmul.mubr.f32.gmra.mxu1 %v3251_v13  ;;  %2279 = vmatprep.subr.mxu0 %v1006_v39 }
 0x1ad   :  { %v990_v16 = vld [vmem:[%s3967_s4 + $0x250] sm:$0xff]  ;;  %736 = vst [vmem:[#allocation3 + $0x68] sm:$0xf] %v703_v37  ;;  %779 = vst [vmem:[#allocation3 + $0x180] sm:$0xfc] %v739_v11  ;;  %v746_v17 = vsel %vm738_vm5, %v740_v35, %v745_v14  ;;  %v752_v3 = vrot.slane %v3249_v12, 6  ;;  %v744_v31 = vsel %vm738_vm5, %v739_v11, %v743_v38  ;;  %2323 = vmatprep.subr.mxu1 %v1038_v40 }
 0x1ae   :  { %781 = vst [vmem:[#allocation3 + $0x98] sm:$0xfc] %v741_v1  ;;  %v751_v18 = vrot.slane %v3247_v10, 6  ;;  %v753_v19 = vrot.slane %v3251_v13, 6  ;;  %v901_v23 = vld [vmem:[#allocation3 + $0x108] sm:$0xff]  ;;  %v1022_v24 = vld [vmem:[%s3967_s4 + $0x350] sm:$0xff]  ;;  %v748_v41 = vsel %vm738_vm5, %v741_v1, %v747_v15  ;;  %2280 = vmatpush3.msra.mxu0 %v990_v16 }
 0x1af   :  { %v903_v20 = vld [vmem:[#allocation3 + $0x1c8] sm:$0xff]  ;;  %784 = vst [vmem:[#allocation3 + $0x1f0] sm:$0x1f] %v746_v17  ;;  %v757_v32 = vrot.slane %v3265_v26, 6  ;;  %v755_v43 = vrot.slane %v3263_v25, 6  ;;  %1251 = vmatprep.mubr.f32.mxu0 %v901_v23  ;;  %v759_v45 = vrot.slane %v3267_v27, 6  ;;  %2324 = vmatpush3.msra.mxu1 %v1022_v24 }
 0x1b0   :  { %1336 = vmatprep.mubr.f32.mxu1 %v903_v20  ;;  %v1005_v42 = vld [vmem:[%s3967_s4 + $0x2c8] sm:$0xff]  ;;  %783 = vst [vmem:[#allocation3 + $0x1a0] sm:$0x1f] %v744_v31  ;;  %785 = vst [vmem:[#allocation3 + $0x168] sm:$0x1f] %v748_v41  ;;  %v797_v46 = vrot.slane %v3227_v56, 5 }
 0x1b1   :  { %v1037_v44 = vld [vmem:[%s3967_s4 + $0x3c8] sm:$0xff]  ;;  %788 = vst [vmem:[#allocation3 + $0x178] sm:$0xfc] %v752_v3  ;;  %787 = vst [vmem:[#allocation3 + $0x1e8] sm:$0xfc] %v751_v18  ;;  %v796_v47 = vrot.slane %v3225_v62, 5  ;;  %v758_v48 = vsel %vm738_vm5, %v752_v3, %v757_v32  ;;  %v756_v49 = vsel %vm738_vm5, %v751_v18, %v755_v43  ;;  %v760_v56 = vsel %vm738_vm5, %v753_v19, %v759_v45 }
 0x1b2   :  { %789 = vst [vmem:[#allocation3 + $0xe0] sm:$0xfc] %v753_v19  ;;  %v798_v50 = vrot.slane %v3229_v57, 5  ;;  %v802_v51 = vrot.slane %v3235_v60, 5  ;;  %v989_v53 = vld [vmem:[%s3967_s4 + $0x248] sm:$0xff]  ;;  %v800_v57 = vrot.slane %v3233_v59, 5  ;;  %2281 = vmatprep.subr.mxu0 %v1005_v42  ;;  %2325 = vmatprep.subr.mxu1 %v1037_v44 }
 0x1b3   :  { %v1021_v62 = vld [vmem:[%s3967_s4 + $0x348] sm:$0xff]  ;;  %792 = vst [vmem:[#allocation3 + $0x38] sm:$0x1f] %v758_v48  ;;  %791 = vst [vmem:[#allocation3 + $0x198] sm:$0x1f] %v756_v49  ;;  %v804_v60 = vrot.slane %v3237_v2, 5  ;;  %2282 = vmatpush3.msra.mxu0 %v989_v53 }
 0x1b4   :  { %837 = vst [vmem:[#allocation3 + $0xd0] sm:$0xf8] %v797_v46  ;;  %836 = vst [vmem:[#allocation3 + $0xa0] sm:$0xf8] %v796_v47  ;;  %v809_v61 = vrot.slane %v3249_v12, 5  ;;  %v900_v54 = vld [vmem:[#allocation3 + $0x138] sm:$0xff]  ;;  %v803_v58 = vsel %vm795_vm6, %v797_v46, %v802_v51  ;;  %v801_v8 = vsel %vm795_vm6, %v796_v47, %v800_v57  ;;  %2326 = vmatpush3.msra.mxu1 %v1021_v62 }
 0x1b5   :  { %v902_v52 = vld [vmem:[#allocation3 + $0x128] sm:$0xff]  ;;  %v1004_v55 = vld [vmem:[%s3967_s4 + $0x2c0] sm:$0xff]  ;;  %793 = vst [vmem:[#allocation3 + $0x140] sm:$0x1f] %v760_v56  ;;  %838 = vst [vmem:[#allocation3 + $0x88] sm:$0xf8] %v798_v50  ;;  %1252 = vmatmul.mubr.f32.gmra.mxu0 %v900_v54  ;;  %v805_v9 = vsel %vm795_vm6, %v798_v50, %v804_v60 }
 0x1b6   :  { %v808_v7 = vrot.slane %v3247_v10, 5  ;;  %v810_v59 = vrot.slane %v3251_v13, 5  ;;  %v814_v2 = vrot.slane %v3265_v26, 5  ;;  %1337 = vmatmul.mubr.f32.gmra.mxu1 %v902_v52  ;;  %v1036_v12 = vld [vmem:[%s3967_s4 + $0x3c0] sm:$0xff]  ;;  %841 = vst [vmem:[#allocation3 + $0x110] sm:$0x3f] %v803_v58  ;;  %2283 = vmatprep.subr.mxu0 %v1004_v55 }
 0x1b7   :  { %845 = vst [vmem:[#allocation3] sm:$0xf8] %v809_v61  ;;  %v812_v21 = vrot.slane %v3263_v25, 5  ;;  %v816_v10 = vrot.slane %v3267_v27, 5  ;;  %v857_v13 = vld [vmem:[#allocation3 + $0xe8] sm:$0xff]  ;;  %v988_v26 = vld [vmem:[%s3967_s4 + $0x240] sm:$0xff]  ;;  %2327 = vmatprep.subr.mxu1 %v1036_v12 }
 0x1b8   :  { %v1020_v22 = vld [vmem:[%s3967_s4 + $0x340] sm:$0xff]  ;;  %840 = vst [vmem:[#allocation3 + $0x70] sm:$0x3f] %v801_v8  ;;  %842 = vst [vmem:[#allocation3 + $0x1d8] sm:$0x3f] %v805_v9  ;;  %v815_v28 = vsel %vm795_vm6, %v809_v61, %v814_v2  ;;  %1406 = vmatprep.mubr.f32.mxu0 %v857_v13  ;;  %v859_v25 = vld [vmem:[#allocation3 + $0x48] sm:$0xff]  ;;  %2284 = vmatpush3.msra.mxu0 %v988_v26 }
 0x1b9   :  { %844 = vst [vmem:[#allocation3 + $0x1e0] sm:$0xf8] %v808_v7  ;;  %846 = vst [vmem:[#allocation3 + $0x170] sm:$0xf8] %v810_v59  ;;  %v1003_v27 = vld [vmem:[%s3967_s4 + $0x2b8] sm:$0xff]  ;;  %v813_v30 = vsel %vm795_vm6, %v808_v7, %v812_v21  ;;  %v817_v33 = vsel %vm795_vm6, %v810_v59, %v816_v10  ;;  %1491 = vmatprep.mubr.f32.mxu1 %v859_v25  ;;  %2328 = vmatpush3.msra.mxu1 %v1020_v22  ;;  %v1002_v63 = vld [vmem:[%s3967_s4 + $0x2b0] sm:$0xff] }
 0x1ba   :  { %v1035_v29 = vld [vmem:[%s3967_s4 + $0x3b8] sm:$0xff]  ;;  %849 = vst [vmem:[#allocation3 + $0x10] sm:$0x3f] %v815_v28  ;;  %848 = vst [vmem:[#allocation3 + $0xd8] sm:$0x3f] %v813_v30  ;;  %v1034_v11 = vld [vmem:[%s3967_s4 + $0x3b0] sm:$0xff]  ;;  %2285 = vmatprep.subr.mxu0 %v1003_v27 }
 0x1bb   :  { %v987_v34 = vld [vmem:[%s3967_s4 + $0x238] sm:$0xff]  ;;  %850 = vst [vmem:[#allocation3 + $0x58] sm:$0x3f] %v817_v33  ;;  %2329 = vmatprep.subr.mxu1 %v1035_v29  ;;  %v986_v1 = vld [vmem:[%s3967_s4 + $0x230] sm:$0xff]  ;;  %v1001_v36 = vld [vmem:[%s3967_s4 + $0x2a8] sm:$0xff] }
 0x1bc   :  { %v1019_v35 = vld [vmem:[%s3967_s4 + $0x338] sm:$0xff]  ;;  %v1018_v14 = vld [vmem:[%s3967_s4 + $0x330] sm:$0xff]  ;;  %2286 = vmatpush3.msra.mxu0 %v987_v34  ;;  %v1033_v37 = vld [vmem:[%s3967_s4 + $0x3a8] sm:$0xff] }
 0x1bd   :  { %2330 = vmatpush3.msra.mxu1 %v1019_v35  ;;  %2287 = vmatprep.subr.mxu0 %v1002_v63  ;;  %v985_v38 = vld [vmem:[%s3967_s4 + $0x228] sm:$0xff]  ;;  %v1000_v39 = vld [vmem:[%s3967_s4 + $0x2a0] sm:$0xff]  ;;  %v999_v3 = vld [vmem:[%s3967_s4 + $0x298] sm:$0xff] }
 0x1be   :  { %2331 = vmatprep.subr.mxu1 %v1034_v11  ;;  %v1017_v15 = vld [vmem:[%s3967_s4 + $0x328] sm:$0xff]  ;;  %2288 = vmatpush3.msra.mxu0 %v986_v1  ;;  %v1032_v40 = vld [vmem:[%s3967_s4 + $0x3a0] sm:$0xff]  ;;  %v1031_v18 = vld [vmem:[%s3967_s4 + $0x398] sm:$0xff] }
 0x1bf   :  { %2332 = vmatpush3.msra.mxu1 %v1018_v14  ;;  %2289 = vmatprep.subr.mxu0 %v1001_v36  ;;  %v984_v16 = vld [vmem:[%s3967_s4 + $0x220] sm:$0xff]  ;;  %v983_v19 = vld [vmem:[%s3967_s4 + $0x218] sm:$0xff]  ;;  %v998_v20 = vld [vmem:[%s3967_s4 + $0x290] sm:$0xff] }
 0x1c0   :  { %2333 = vmatprep.subr.mxu1 %v1033_v37  ;;  %v1016_v17 = vld [vmem:[%s3967_s4 + $0x320] sm:$0xff]  ;;  %2290 = vmatpush3.msra.mxu0 %v985_v38  ;;  %v1015_v23 = vld [vmem:[%s3967_s4 + $0x318] sm:$0xff]  ;;  %v1030_v24 = vld [vmem:[%s3967_s4 + $0x390] sm:$0xff] }
 0x1c1   :  { %2334 = vmatpush3.msra.mxu1 %v1017_v15  ;;  %2291 = vmatprep.subr.mxu0 %v1000_v39  ;;  %v982_v31 = vld [vmem:[%s3967_s4 + $0x210] sm:$0xff]  ;;  %v997_v32 = vld [vmem:[%s3967_s4 + $0x288] sm:$0xff]  ;;  %v996_v45 = vld [vmem:[%s3967_s4 + $0x280] sm:$0xff] }
 0x1c2   :  { %2335 = vmatprep.subr.mxu1 %v1032_v40  ;;  %2292 = vmatpush3.msra.mxu0 %v984_v16  ;;  %v1014_v41 = vld [vmem:[%s3967_s4 + $0x310] sm:$0xff]  ;;  %v1029_v43 = vld [vmem:[%s3967_s4 + $0x388] sm:$0xff]  ;;  %v1028_v46 = vld [vmem:[%s3967_s4 + $0x380] sm:$0xff] }
 0x1c3   :  { %2336 = vmatpush3.msra.mxu1 %v1016_v17  ;;  %2293 = vmatprep.subr.mxu0 %v999_v3  ;;  %v981_v42 = vld [vmem:[%s3967_s4 + $0x208] sm:$0xff]  ;;  %v980_v47 = vld [vmem:[%s3967_s4 + $0x200] sm:$0xff]  ;;  %v1075_v49 = vld [vmem:[%s3967_s4 + $0x4f8] sm:$0xff] }
 0x1c4   :  { %2337 = vmatprep.subr.mxu1 %v1031_v18  ;;  %2294 = vmatpush3.msra.mxu0 %v983_v19  ;;  %v1013_v44 = vld [vmem:[%s3967_s4 + $0x308] sm:$0xff]  ;;  %v1012_v48 = vld [vmem:[%s3967_s4 + $0x300] sm:$0xff]  ;;  %v1107_v50 = vld [vmem:[%s3967_s4 + $0x5f8] sm:$0xff] }
 0x1c5   :  { %2338 = vmatpush3.msra.mxu1 %v1015_v23  ;;  %2295 = vmatprep.subr.mxu0 %v998_v20  ;;  %v856_v51 = vld [vmem:[#allocation3 + $0x50] sm:$0xff]  ;;  %v1059_v62 = vld [vmem:[%s3967_s4 + $0x478] sm:$0xff]  ;;  %v875_v61 = vld [vmem:[#allocation3 + $0xa8] sm:$0xff] }
 0x1c6   :  { %2339 = vmatprep.subr.mxu1 %v1030_v24  ;;  %2296 = vmatpush3.msra.mxu0 %v982_v31  ;;  %v858_v53 = vld [vmem:[#allocation3 + $0xb0] sm:$0xff]  ;;  %v1091_v56 = vld [vmem:[%s3967_s4 + $0x578] sm:$0xff]  ;;  %v1073_v58 = vld [vmem:[%s3967_s4 + $0x4e8] sm:$0xff] }
 0x1c7   :  { %2340 = vmatpush3.msra.mxu1 %v1014_v41  ;;  %2297 = vmatprep.subr.mxu0 %v997_v32  ;;  %v1074_v57 = vld [vmem:[%s3967_s4 + $0x4f0] sm:$0xff]  ;;  %v873_v60 = vld [vmem:[#allocation3 + $0x1f8] sm:$0xff]  ;;  %v1105_v7 = vld [vmem:[%s3967_s4 + $0x5e8] sm:$0xff] }
 0x1c8   :  { %2341 = vmatprep.subr.mxu1 %v1029_v43  ;;  %2298 = vmatpush3.msra.mxu0 %v981_v42  ;;  %v1106_v54 = vld [vmem:[%s3967_s4 + $0x5f0] sm:$0xff]  ;;  %v872_v59 = vld [vmem:[#allocation3 + $0x40] sm:$0xff]  ;;  %v1057_v12 = vld [vmem:[%s3967_s4 + $0x468] sm:$0xff] }
 0x1c9   :  { %2342 = vmatpush3.msra.mxu1 %v1013_v44  ;;  %2299 = vmatprep.subr.mxu0 %v996_v45  ;;  %v1058_v52 = vld [vmem:[%s3967_s4 + $0x470] sm:$0xff]  ;;  %v874_v2 = vld [vmem:[#allocation3 + $0x20] sm:$0xff]  ;;  %v1089_v8 = vld [vmem:[%s3967_s4 + $0x568] sm:$0xff] }
 0x1ca   :  { %2343 = vmatprep.subr.mxu1 %v1028_v46  ;;  %2300 = vmatpush3.msra.mxu0 %v980_v47  ;;  %v1090_v55 = vld [vmem:[%s3967_s4 + $0x570] sm:$0xff]  ;;  %v1072_v9 = vld [vmem:[%s3967_s4 + $0x4e0] sm:$0xff]  ;;  %v889_v21 = vld [vmem:[#allocation3 + $0x1a8] sm:$0xff] }
 0x1cb   :  { %2344 = vmatpush3.msra.mxu1 %v1012_v48  ;;  %1407 = vmatmul.mubr.f32.vlgmr.msra.gmra.mxu0 %v856_v51  ;;  %v891_v10 = vld [vmem:[#allocation3 + $0x28] sm:$0xff]  ;;  %v1104_v13 = vld [vmem:[%s3967_s4 + $0x5e0] sm:$0xff]  ;;  %v1071_v28 = vld [vmem:[%s3967_s4 + $0x4d8] sm:$0xff] }
 0x1cc   :  { %1492 = vmatmul.mubr.f32.vlgmr.msra.gmra.mxu1 %v858_v53  ;;  %2357 = vmatprep.subr.mxu0 %v1075_v49  ;;  %v1056_v26 = vld [vmem:[%s3967_s4 + $0x460] sm:$0xff]  ;;  %v1103_v25 = vld [vmem:[%s3967_s4 + $0x5d8] sm:$0xff]  ;;  %v1070_v34 = vld [vmem:[%s3967_s4 + $0x4d0] sm:$0xff] }
 0x1cd   :  { %2401 = vmatprep.subr.mxu1 %v1107_v50  ;;  %1411 = vmatprep.mubr.f32.mxu0 %v873_v60  ;;  %v1088_v22 = vld [vmem:[%s3967_s4 + $0x560] sm:$0xff]  ;;  %v890_v29 = vld [vmem:[#allocation3 + $0x1b8] sm:$0xff]  ;;  %v907_v63 = vld [vmem:[#allocation3 + $0x190] sm:$0xff] }
 0x1ce   :  { %1496 = vmatprep.mubr.f32.mxu1 %v875_v61  ;;  %2358 = vmatpush3.msra.mxu0 %v1059_v62  ;;  %v888_v27 = vld [vmem:[#allocation3 + $0x100] sm:$0xff]  ;;  %v1055_v30 = vld [vmem:[%s3967_s4 + $0x458] sm:$0xff]  ;;  %v1102_v11 = vld [vmem:[%s3967_s4 + $0x5d0] sm:$0xff] }
 0x1cf   :  { %2402 = vmatpush3.msra.mxu1 %v1091_v56  ;;  %2359 = vmatprep.subr.mxu0 %v1074_v57  ;;  %v1087_v33 = vld [vmem:[%s3967_s4 + $0x558] sm:$0xff]  ;;  %v1054_v1 = vld [vmem:[%s3967_s4 + $0x450] sm:$0xff]  ;;  %v1069_v36 = vld [vmem:[%s3967_s4 + $0x4c8] sm:$0xff] }
 0x1d0   :  { %2403 = vmatprep.subr.mxu1 %v1106_v54  ;;  %2360 = vmatpush3.msra.mxu0 %v1058_v52  ;;  %v905_v35 = vld [vmem:[#allocation3 + $0xf8] sm:$0xff]  ;;  %v1086_v14 = vld [vmem:[%s3967_s4 + $0x550] sm:$0xff]  ;;  %v1101_v37 = vld [vmem:[%s3967_s4 + $0x5c8] sm:$0xff] }
 0x1d1   :  { %2404 = vmatpush3.msra.mxu1 %v1090_v55  ;;  %1412 = vmatmul.mubr.f32.gmra.mxu0 %v872_v59  ;;  %v904_v38 = vld [vmem:[#allocation3 + $0xf0] sm:$0xff]  ;;  %v906_v15 = vld [vmem:[#allocation3 + $0x68] sm:$0xff]  ;;  %v1068_v17 = vld [vmem:[%s3967_s4 + $0x4c0] sm:$0xff] }
 0x1d2   :  { %1497 = vmatmul.mubr.f32.gmra.mxu1 %v874_v2  ;;  %2361 = vmatprep.subr.mxu0 %v1073_v58  ;;  %v1053_v39 = vld [vmem:[%s3967_s4 + $0x448] sm:$0xff]  ;;  %v861_v16 = vld [vmem:[#allocation3 + $0x90] sm:$0xff]  ;;  %v1100_v3 = vld [vmem:[%s3967_s4 + $0x5c0] sm:$0xff] }
 0x1d3   :  { %2405 = vmatprep.subr.mxu1 %v1105_v7  ;;  %1416 = vmatprep.mubr.f32.mxu0 %v889_v21  ;;  %v1085_v40 = vld [vmem:[%s3967_s4 + $0x548] sm:$0xff]  ;;  %v863_v18 = vld [vmem:[#allocation3 + $0x118] sm:$0xff]  ;;  %v1052_v19 = vld [vmem:[%s3967_s4 + $0x440] sm:$0xff] }
 0x1d4   :  { %1501 = vmatprep.mubr.f32.mxu1 %v891_v10  ;;  %2362 = vmatpush3.msra.mxu0 %v1057_v12  ;;  %v1084_v23 = vld [vmem:[%s3967_s4 + $0x540] sm:$0xff]  ;;  %v1067_v20 = vld [vmem:[%s3967_s4 + $0x4b8] sm:$0xff]  ;;  %v1066_v32 = vld [vmem:[%s3967_s4 + $0x4b0] sm:$0xff] }
 0x1d5   :  { %2406 = vmatpush3.msra.mxu1 %v1089_v8  ;;  %2363 = vmatprep.subr.mxu0 %v1072_v9  ;;  %v1099_v24 = vld [vmem:[%s3967_s4 + $0x5b8] sm:$0xff]  ;;  %v1098_v43 = vld [vmem:[%s3967_s4 + $0x5b0] sm:$0xff]  ;;  %v1065_v45 = vld [vmem:[%s3967_s4 + $0x4a8] sm:$0xff] }
 0x1d6   :  { %2407 = vmatprep.subr.mxu1 %v1104_v13  ;;  %2364 = vmatpush3.msra.mxu0 %v1056_v26  ;;  %v1051_v31 = vld [vmem:[%s3967_s4 + $0x438] sm:$0xff]  ;;  %v1050_v42 = vld [vmem:[%s3967_s4 + $0x430] sm:$0xff]  ;;  %v1097_v46 = vld [vmem:[%s3967_s4 + $0x5a8] sm:$0xff] }
 0x1d7   :  { %2408 = vmatpush3.msra.mxu1 %v1088_v22  ;;  %1417 = vmatmul.mubr.f32.gmra.mxu0 %v888_v27  ;;  %v1083_v41 = vld [vmem:[%s3967_s4 + $0x538] sm:$0xff]  ;;  %v1082_v44 = vld [vmem:[%s3967_s4 + $0x530] sm:$0xff]  ;;  %v1049_v47 = vld [vmem:[%s3967_s4 + $0x428] sm:$0xff] }
 0x1d8   :  { %1502 = vmatmul.mubr.f32.gmra.mxu1 %v890_v29  ;;  %2365 = vmatprep.subr.mxu0 %v1071_v28  ;;  %v1081_v48 = vld [vmem:[%s3967_s4 + $0x528] sm:$0xff]  ;;  %v1064_v49 = vld [vmem:[%s3967_s4 + $0x4a0] sm:$0xff]  ;;  %v1063_v62 = vld [vmem:[%s3967_s4 + $0x498] sm:$0xff] }
 0x1d9   :  { %2409 = vmatprep.subr.mxu1 %v1103_v25  ;;  %1421 = vmatprep.mubr.f32.mxu0 %v905_v35  ;;  %v1096_v50 = vld [vmem:[%s3967_s4 + $0x5a0] sm:$0xff]  ;;  %v1095_v56 = vld [vmem:[%s3967_s4 + $0x598] sm:$0xff]  ;;  %v1062_v61 = vld [vmem:[%s3967_s4 + $0x490] sm:$0xff] }
 0x1da   :  { %1506 = vmatprep.mubr.f32.mxu1 %v907_v63  ;;  %2366 = vmatpush3.msra.mxu0 %v1055_v30  ;;  %v1048_v51 = vld [vmem:[%s3967_s4 + $0x420] sm:$0xff]  ;;  %v1047_v57 = vld [vmem:[%s3967_s4 + $0x418] sm:$0xff]  ;;  %v1094_v54 = vld [vmem:[%s3967_s4 + $0x590] sm:$0xff] }
 0x1db   :  { %2410 = vmatpush3.msra.mxu1 %v1087_v33  ;;  %2367 = vmatprep.subr.mxu0 %v1070_v34  ;;  %v1080_v53 = vld [vmem:[%s3967_s4 + $0x520] sm:$0xff]  ;;  %v1079_v60 = vld [vmem:[%s3967_s4 + $0x518] sm:$0xff]  ;;  %v1046_v52 = vld [vmem:[%s3967_s4 + $0x410] sm:$0xff] }
 0x1dc   :  { %2411 = vmatprep.subr.mxu1 %v1102_v11  ;;  %2368 = vmatpush3.msra.mxu0 %v1054_v1  ;;  %v1078_v55 = vld [vmem:[%s3967_s4 + $0x510] sm:$0xff]  ;;  %v1061_v58 = vld [vmem:[%s3967_s4 + $0x488] sm:$0xff]  ;;  %v1060_v12 = vld [vmem:[%s3967_s4 + $0x480] sm:$0xff] }
 0x1dd   :  { %2412 = vmatpush3.msra.mxu1 %v1086_v14  ;;  %1422 = vmatmul.mubr.f32.gmra.mxu0 %v904_v38  ;;  %v1093_v7 = vld [vmem:[%s3967_s4 + $0x588] sm:$0xff]  ;;  %v1092_v8 = vld [vmem:[%s3967_s4 + $0x580] sm:$0xff]  ;;  %v1139_v10 = vld [vmem:[%s3967_s4 + $0x6f8] sm:$0xff] }
 0x1de   :  { %1507 = vmatmul.mubr.f32.gmra.mxu1 %v906_v15  ;;  %2369 = vmatprep.subr.mxu0 %v1069_v36  ;;  %v1045_v59 = vld [vmem:[%s3967_s4 + $0x408] sm:$0xff]  ;;  %v1044_v9 = vld [vmem:[%s3967_s4 + $0x400] sm:$0xff]  ;;  %v1171_v13 = vld [vmem:[%s3967_s4 + $0x7f8] sm:$0xff] }
 0x1df   :  { %2413 = vmatprep.subr.mxu1 %v1101_v37  ;;  %2370 = vmatpush3.msra.mxu0 %v1053_v39  ;;  %v1077_v2 = vld [vmem:[%s3967_s4 + $0x508] sm:$0xff]  ;;  %v1076_v21 = vld [vmem:[%s3967_s4 + $0x500] sm:$0xff]  ;;  %v862_v22 = vld [vmem:[#allocation3 + $0x98] sm:$0xff] }
 0x1e0   :  { %1576 = vmatprep.mubr.f32.mxu0 %v861_v16  ;;  %2414 = vmatpush3.msra.mxu1 %v1085_v40  ;;  %v860_v26 = vld [vmem:[#allocation3 + $0x180] sm:$0xff]  ;;  %v1123_v28 = vld [vmem:[%s3967_s4 + $0x678] sm:$0xff]  ;;  %v1138_v27 = vld [vmem:[%s3967_s4 + $0x6f0] sm:$0xff] }
 0x1e1   :  { %1661 = vmatprep.mubr.f32.mxu1 %v863_v18  ;;  %2371 = vmatprep.subr.mxu0 %v1068_v17  ;;  %v1155_v25 = vld [vmem:[%s3967_s4 + $0x778] sm:$0xff]  ;;  %v877_v29 = vld [vmem:[#allocation3 + $0x1f0] sm:$0xff]  ;;  %v1137_v63 = vld [vmem:[%s3967_s4 + $0x6e8] sm:$0xff] }
 0x1e2   :  { %2415 = vmatprep.subr.mxu1 %v1100_v3  ;;  %2372 = vmatpush3.msra.mxu0 %v1052_v19  ;;  %v879_v30 = vld [vmem:[#allocation3 + $0x78] sm:$0xff]  ;;  %v1170_v33 = vld [vmem:[%s3967_s4 + $0x7f0] sm:$0xff]  ;;  %v1169_v11 = vld [vmem:[%s3967_s4 + $0x7e8] sm:$0xff] }
 0x1e3   :  { %2416 = vmatpush3.msra.mxu1 %v1084_v23  ;;  %2373 = vmatprep.subr.mxu0 %v1067_v20  ;;  %v1122_v34 = vld [vmem:[%s3967_s4 + $0x670] sm:$0xff]  ;;  %v876_v1 = vld [vmem:[#allocation3 + $0x1a0] sm:$0xff]  ;;  %v878_v14 = vld [vmem:[#allocation3 + $0x168] sm:$0xff] }
 0x1e4   :  { %2417 = vmatprep.subr.mxu1 %v1099_v24  ;;  %2374 = vmatpush3.msra.mxu0 %v1051_v31  ;;  %v1154_v35 = vld [vmem:[%s3967_s4 + $0x770] sm:$0xff]  ;;  %v1121_v36 = vld [vmem:[%s3967_s4 + $0x668] sm:$0xff]  ;;  %v1136_v38 = vld [vmem:[%s3967_s4 + $0x6e0] sm:$0xff] }
 0x1e5   :  { %2418 = vmatpush3.msra.mxu1 %v1083_v41  ;;  %2375 = vmatprep.subr.mxu0 %v1066_v32  ;;  %v1153_v37 = vld [vmem:[%s3967_s4 + $0x768] sm:$0xff]  ;;  %v893_v15 = vld [vmem:[#allocation3 + $0x178] sm:$0xff]  ;;  %v895_v39 = vld [vmem:[#allocation3 + $0x30] sm:$0xff] }
 0x1e6   :  { %2419 = vmatprep.subr.mxu1 %v1098_v43  ;;  %2376 = vmatpush3.msra.mxu0 %v1050_v42  ;;  %v1168_v40 = vld [vmem:[%s3967_s4 + $0x7e0] sm:$0xff]  ;;  %v1135_v3 = vld [vmem:[%s3967_s4 + $0x6d8] sm:$0xff]  ;;  %v892_v19 = vld [vmem:[#allocation3 + $0x1e8] sm:$0xff] }
 0x1e7   :  { %2420 = vmatpush3.msra.mxu1 %v1082_v44  ;;  %2377 = vmatprep.subr.mxu0 %v1065_v45  ;;  %v1120_v16 = vld [vmem:[%s3967_s4 + $0x660] sm:$0xff]  ;;  %v1167_v18 = vld [vmem:[%s3967_s4 + $0x7d8] sm:$0xff]  ;;  %v1134_v31 = vld [vmem:[%s3967_s4 + $0x6d0] sm:$0xff] }
 0x1e8   :  { %2421 = vmatprep.subr.mxu1 %v1097_v46  ;;  %2378 = vmatpush3.msra.mxu0 %v1049_v47  ;;  %v1152_v17 = vld [vmem:[%s3967_s4 + $0x760] sm:$0xff]  ;;  %v1119_v20 = vld [vmem:[%s3967_s4 + $0x658] sm:$0xff]  ;;  %v1166_v43 = vld [vmem:[%s3967_s4 + $0x7d0] sm:$0xff] }
 0x1e9   :  { %2422 = vmatpush3.msra.mxu1 %v1081_v48  ;;  %2379 = vmatprep.subr.mxu0 %v1064_v49  ;;  %v894_v23 = vld [vmem:[#allocation3 + $0xe0] sm:$0xff]  ;;  %v1151_v24 = vld [vmem:[%s3967_s4 + $0x758] sm:$0xff]  ;;  %v1118_v42 = vld [vmem:[%s3967_s4 + $0x650] sm:$0xff] }
 0x1ea   :  { %2423 = vmatprep.subr.mxu1 %v1096_v50  ;;  %2380 = vmatpush3.msra.mxu0 %v1048_v51  ;;  %v909_v41 = vld [vmem:[#allocation3 + $0x38] sm:$0xff]  ;;  %v911_v32 = vld [vmem:[#allocation3 + $0x1c0] sm:$0xff]  ;;  %v1150_v44 = vld [vmem:[%s3967_s4 + $0x750] sm:$0xff] }
 0x1eb   :  { %2424 = vmatpush3.msra.mxu1 %v1080_v53  ;;  %2381 = vmatprep.subr.mxu0 %v1063_v62  ;;  %v1133_v45 = vld [vmem:[%s3967_s4 + $0x6c8] sm:$0xff]  ;;  %v908_v47 = vld [vmem:[#allocation3 + $0x198] sm:$0xff]  ;;  %v910_v48 = vld [vmem:[#allocation3 + $0x140] sm:$0xff] }
 0x1ec   :  { %2425 = vmatprep.subr.mxu1 %v1095_v56  ;;  %2382 = vmatpush3.msra.mxu0 %v1047_v57  ;;  %v1165_v46 = vld [vmem:[%s3967_s4 + $0x7c8] sm:$0xff]  ;;  %v865_v51 = vld [vmem:[#allocation3 + $0xd0] sm:$0xff]  ;;  %v1132_v53 = vld [vmem:[%s3967_s4 + $0x6c0] sm:$0xff] }
 0x1ed   :  { %2426 = vmatpush3.msra.mxu1 %v1079_v60  ;;  %2383 = vmatprep.subr.mxu0 %v1062_v61  ;;  %v1117_v49 = vld [vmem:[%s3967_s4 + $0x648] sm:$0xff]  ;;  %v1164_v62 = vld [vmem:[%s3967_s4 + $0x7c0] sm:$0xff]  ;;  %v1131_v61 = vld [vmem:[%s3967_s4 + $0x6b8] sm:$0xff] }
 0x1ee   :  { %2427 = vmatprep.subr.mxu1 %v1094_v54  ;;  %2384 = vmatpush3.msra.mxu0 %v1046_v52  ;;  %v1149_v50 = vld [vmem:[%s3967_s4 + $0x748] sm:$0xff]  ;;  %v867_v56 = vld [vmem:[#allocation3 + $0x60] sm:$0xff]  ;;  %v1163_v54 = vld [vmem:[%s3967_s4 + $0x7b8] sm:$0xff] }
 0x1ef   :  { %2428 = vmatpush3.msra.mxu1 %v1078_v55  ;;  %2385 = vmatprep.subr.mxu0 %v1061_v58  ;;  %v1116_v57 = vld [vmem:[%s3967_s4 + $0x640] sm:$0xff]  ;;  %v1115_v52 = vld [vmem:[%s3967_s4 + $0x638] sm:$0xff]  ;;  %v1130_v58 = vld [vmem:[%s3967_s4 + $0x6b0] sm:$0xff] }
 0x1f0   :  { %2429 = vmatprep.subr.mxu1 %v1093_v7  ;;  %2386 = vmatpush3.msra.mxu0 %v1045_v59  ;;  %v1148_v60 = vld [vmem:[%s3967_s4 + $0x740] sm:$0xff]  ;;  %v1147_v55 = vld [vmem:[%s3967_s4 + $0x738] sm:$0xff]  ;;  %v1162_v7 = vld [vmem:[%s3967_s4 + $0x7b0] sm:$0xff] }
 0x1f1   :  { %2430 = vmatpush3.msra.mxu1 %v1077_v2  ;;  %2387 = vmatprep.subr.mxu0 %v1060_v12  ;;  %v1114_v59 = vld [vmem:[%s3967_s4 + $0x630] sm:$0xff]  ;;  %v1129_v12 = vld [vmem:[%s3967_s4 + $0x6a8] sm:$0xff] }
 0x1f2   :  { %2431 = vmatprep.subr.mxu1 %v1092_v8  ;;  %2388 = vmatpush3.msra.mxu0 %v1044_v9  ;;  %v1146_v2 = vld [vmem:[%s3967_s4 + $0x730] sm:$0xff]  ;;  %v1161_v8 = vld [vmem:[%s3967_s4 + $0x7a8] sm:$0xff] }
 0x1f3   :  { %2432 = vmatpush3.msra.mxu1 %v1076_v21  ;;  %1577 = vmatmul.mubr.f32.vlgmr.msra.gmra.mxu0 %v860_v26  ;;  %v1113_v9 = vld [vmem:[%s3967_s4 + $0x628] sm:$0xff]  ;;  %v1112_v26 = vld [vmem:[%s3967_s4 + $0x620] sm:$0xff] }
 0x1f4   :  { %1662 = vmatmul.mubr.f32.vlgmr.msra.gmra.mxu1 %v862_v22  ;;  %2445 = vmatprep.subr.mxu0 %v1139_v10  ;;  %v1145_v21 = vld [vmem:[%s3967_s4 + $0x728] sm:$0xff]  ;;  %v1128_v10 = vld [vmem:[%s3967_s4 + $0x6a0] sm:$0xff] }
 0x1f5   :  { %2489 = vmatprep.subr.mxu1 %v1171_v13  ;;  %1581 = vmatprep.mubr.f32.mxu0 %v877_v29  ;;  %v1160_v13 = vld [vmem:[%s3967_s4 + $0x7a0] sm:$0xff]  ;;  %v1143_v29 = vld [vmem:[%s3967_s4 + $0x718] sm:$0xff] }
 0x1f6   :  { %1666 = vmatprep.mubr.f32.mxu1 %v879_v30  ;;  %2446 = vmatpush3.msra.mxu0 %v1123_v28  ;;  %v1144_v22 = vld [vmem:[%s3967_s4 + $0x720] sm:$0xff]  ;;  %v1127_v28 = vld [vmem:[%s3967_s4 + $0x698] sm:$0xff]  ;;  %v1126_v30 = vld [vmem:[%s3967_s4 + $0x690] sm:$0xff] }
 0x1f7   :  { %2490 = vmatpush3.msra.mxu1 %v1155_v25  ;;  %2447 = vmatprep.subr.mxu0 %v1138_v27  ;;  %v1159_v25 = vld [vmem:[%s3967_s4 + $0x798] sm:$0xff] }
 0x1f8   :  { %2491 = vmatprep.subr.mxu1 %v1170_v33  ;;  %2448 = vmatpush3.msra.mxu0 %v1122_v34  ;;  %v1111_v27 = vld [vmem:[%s3967_s4 + $0x618] sm:$0xff]  ;;  %v1158_v33 = vld [vmem:[%s3967_s4 + $0x790] sm:$0xff] }
 0x1f9   :  { %2492 = vmatpush3.msra.mxu1 %v1154_v35  ;;  %1582 = vmatmul.mubr.f32.gmra.mxu0 %v876_v1  ;;  %v1110_v34 = vld [vmem:[%s3967_s4 + $0x610] sm:$0xff]  ;;  %v1109_v1 = vld [vmem:[%s3967_s4 + $0x608] sm:$0xff] }
 0x1fa   :  { %1667 = vmatmul.mubr.f32.gmra.mxu1 %v878_v14  ;;  %2449 = vmatprep.subr.mxu0 %v1137_v63  ;;  %v1142_v35 = vld [vmem:[%s3967_s4 + $0x710] sm:$0xff]  ;;  %v1125_v63 = vld [vmem:[%s3967_s4 + $0x688] sm:$0xff] }
 0x1fb   :  { %2493 = vmatprep.subr.mxu1 %v1169_v11  ;;  %1586 = vmatprep.mubr.f32.mxu0 %v893_v15  ;;  %v1157_v11 = vld [vmem:[%s3967_s4 + $0x788] sm:$0xff]  ;;  %v1140_v15 = vld [vmem:[%s3967_s4 + $0x700] sm:$0xff] }
 0x1fc   :  { %1671 = vmatprep.mubr.f32.mxu1 %v895_v39  ;;  %2450 = vmatpush3.msra.mxu0 %v1121_v36  ;;  %v1141_v14 = vld [vmem:[%s3967_s4 + $0x708] sm:$0xff]  ;;  %v1124_v36 = vld [vmem:[%s3967_s4 + $0x680] sm:$0xff] }
 0x1fd   :  { %2494 = vmatpush3.msra.mxu1 %v1153_v37  ;;  %2451 = vmatprep.subr.mxu0 %v1136_v38  ;;  %v1156_v37 = vld [vmem:[%s3967_s4 + $0x780] sm:$0xff] }
 0x1fe   :  { %2495 = vmatprep.subr.mxu1 %v1168_v40  ;;  %2452 = vmatpush3.msra.mxu0 %v1120_v16  ;;  %v1108_v38 = vld [vmem:[%s3967_s4 + $0x600] sm:$0xff]  ;;  %v866_v40 = vld [vmem:[#allocation3 + $0x88] sm:$0xff]  ;;  %v881_v16 = vld [vmem:[#allocation3 + $0x110] sm:$0xff] }
 0x1ff   :  { %2496 = vmatpush3.msra.mxu1 %v1152_v17  ;;  %1587 = vmatmul.mubr.f32.gmra.mxu0 %v892_v19  ;;  %v864_v39 = vld [vmem:[#allocation3 + $0xa0] sm:$0xff]  ;;  %v883_v17 = vld [vmem:[#allocation3 + $0x150] sm:$0xff]  ;;  %v882_v19 = vld [vmem:[#allocation3 + $0x1d8] sm:$0xff] }
 0x200   :  { %1672 = vmatmul.mubr.f32.gmra.mxu1 %v894_v23  ;;  %2453 = vmatprep.subr.mxu0 %v1135_v3  ;;  %v3915_v3 = vld [vmem:[#allocation4 + $0x58] sm:$0xff]  ;;  %v897_v23 = vld [vmem:[#allocation3] sm:$0xff] }
 0x201   :  { %2497 = vmatprep.subr.mxu1 %v1167_v18  ;;  %1591 = vmatprep.mubr.f32.mxu0 %v909_v41  ;;  %v880_v18 = vld [vmem:[#allocation3 + $0x70] sm:$0xff] }
 0x202   :  { %1676 = vmatprep.mubr.f32.mxu1 %v911_v32  ;;  %2454 = vmatpush3.msra.mxu0 %v1119_v20  ;;  %v899_v20 = vld [vmem:[#allocation3 + $0x8] sm:$0xff]  ;;  %v913_v41 = vld [vmem:[#allocation3 + $0x10] sm:$0xff]  ;;  %v915_v32 = vld [vmem:[#allocation3 + $0x120] sm:$0xff] }
 0x203   :  { %2498 = vmatpush3.msra.mxu1 %v1151_v24  ;;  %2455 = vmatprep.subr.mxu0 %v1134_v31  ;;  %v896_v24 = vld [vmem:[#allocation3 + $0x1e0] sm:$0xff]  ;;  %v898_v31 = vld [vmem:[#allocation3 + $0x170] sm:$0xff] }
 0x204   :  { %2499 = vmatprep.subr.mxu1 %v1166_v43  ;;  %2456 = vmatpush3.msra.mxu0 %v1118_v42  ;;  %v912_v43 = vld [vmem:[#allocation3 + $0xd8] sm:$0xff] }
 0x205   :  { %2500 = vmatpush3.msra.mxu1 %v1150_v44  ;;  %1592 = vmatmul.mubr.f32.gmra.mxu0 %v908_v47  ;;  %v914_v42 = vld [vmem:[#allocation3 + $0x58] sm:$0xff] }
 0x206   :  { %1677 = vmatmul.mubr.f32.gmra.mxu1 %v910_v48  ;;  %2457 = vmatprep.subr.mxu0 %v1133_v45 }
 0x207   :  { %2501 = vmatprep.subr.mxu1 %v1165_v46  ;;  %2458 = vmatpush3.msra.mxu0 %v1117_v49 }
 0x208   :  { %1746 = vmatprep.mubr.f32.mxu0 %v865_v51  ;;  %2502 = vmatpush3.msra.mxu1 %v1149_v50 }
 0x209   :  { %1831 = vmatprep.mubr.f32.mxu1 %v867_v56  ;;  %2459 = vmatprep.subr.mxu0 %v1132_v53 }
 0x20a   :  { %2503 = vmatprep.subr.mxu1 %v1164_v62  ;;  %2460 = vmatpush3.msra.mxu0 %v1116_v57 }
 0x20b   :  { %2504 = vmatpush3.msra.mxu1 %v1148_v60  ;;  %2461 = vmatprep.subr.mxu0 %v1131_v61 }
 0x20c   :  { %2505 = vmatprep.subr.mxu1 %v1163_v54  ;;  %2462 = vmatpush3.msra.mxu0 %v1115_v52 }
 0x20d   :  { %2506 = vmatpush3.msra.mxu1 %v1147_v55  ;;  %2463 = vmatprep.subr.mxu0 %v1130_v58 }
 0x20e   :  { %2507 = vmatprep.subr.mxu1 %v1162_v7  ;;  %2464 = vmatpush3.msra.mxu0 %v1114_v59 }
 0x20f   :  { %2508 = vmatpush3.msra.mxu1 %v1146_v2  ;;  %2465 = vmatprep.subr.mxu0 %v1129_v12 }
 0x210   :  { %2509 = vmatprep.subr.mxu1 %v1161_v8  ;;  %2466 = vmatpush3.msra.mxu0 %v1113_v9 }
 0x211   :  { %2510 = vmatpush3.msra.mxu1 %v1145_v21  ;;  %2467 = vmatprep.subr.mxu0 %v1128_v10 }
 0x212   :  { %2511 = vmatprep.subr.mxu1 %v1160_v13  ;;  %2468 = vmatpush3.msra.mxu0 %v1112_v26 }
 0x213   :  { %2512 = vmatpush3.msra.mxu1 %v1144_v22  ;;  %2469 = vmatprep.subr.mxu0 %v1127_v28 }
 0x214   :  { %2513 = vmatprep.subr.mxu1 %v1159_v25  ;;  %2470 = vmatpush3.msra.mxu0 %v1111_v27 }
 0x215   :  { %2514 = vmatpush3.msra.mxu1 %v1143_v29  ;;  %2471 = vmatprep.subr.mxu0 %v1126_v30 }
 0x216   :  { %2515 = vmatprep.subr.mxu1 %v1158_v33  ;;  %2472 = vmatpush3.msra.mxu0 %v1110_v34 }
 0x217   :  { %2516 = vmatpush3.msra.mxu1 %v1142_v35  ;;  %2473 = vmatprep.subr.mxu0 %v1125_v63  ;;  %v3926_v35 = vld [vmem:[%s3970_s7] sm:$0xf] }
 0x218   :  { %2517 = vmatprep.subr.mxu1 %v1157_v11  ;;  %2474 = vmatpush3.msra.mxu0 %v1109_v1  ;;  %3978 = vst [vmem:[#allocation6_spill] sm:$0xff] %v3926_v35  ;;  %v2021_v63 = vrot.slane %v3926_v35, %v3190_v4  ;;  %v2029_v11 = vrot.slane %v3926_v35, %v3194_v6 }
 0x219   :  { %2518 = vmatpush3.msra.mxu1 %v1141_v14  ;;  %2475 = vmatprep.subr.mxu0 %v1124_v36 }
 0x21a   :  { %2519 = vmatprep.subr.mxu1 %v1156_v37  ;;  %2476 = vmatpush3.msra.mxu0 %v1108_v38 }
 0x21b   :  { %2520 = vmatpush3.msra.mxu1 %v1140_v15  ;;  %1747 = vmatmul.mubr.f32.vlgmr.msra.gmra.mxu0 %v864_v39 }
 0x21c   :  { %1832 = vmatmul.mubr.f32.vlgmr.msra.gmra.mxu1 %v866_v40  ;;  %1751 = vmatprep.mubr.f32.mxu0 %v881_v16 }
 0x21d   :  { %1836 = vmatprep.mubr.f32.mxu1 %v883_v17  ;;  %2054 = vmatprep.subr.mxu0 %v3915_v3 }
 0x21e   :  { %2055 = vmatpush1.xpose.msra.mxu0 %v3915_v3 }
 0x21f   :  { %1752 = vmatmul.mubr.f32.gmra.mxu0 %v880_v18 }
 0x220   :  { %1837 = vmatmul.mubr.f32.gmra.mxu1 %v882_v19  ;;  %1756 = vmatprep.mubr.f32.mxu0 %v897_v23 }
 0x221   :  { %1841 = vmatprep.mubr.f32.mxu1 %v899_v20 }
 0x223   :  { %1757 = vmatmul.mubr.f32.gmra.mxu0 %v896_v24 }
 0x224   :  { %1842 = vmatmul.mubr.f32.gmra.mxu1 %v898_v31  ;;  %1761 = vmatprep.mubr.f32.mxu0 %v913_v41 }
 0x225   :  { %1846 = vmatprep.mubr.f32.mxu1 %v915_v32 }
 0x227   :  { %1762 = vmatmul.mubr.f32.gmra.mxu0 %v912_v43 }
 0x228   :  { %1847 = vmatmul.mubr.f32.gmra.mxu1 %v914_v42  ;;  %2098 = vmatprep.mubr.f32.mxu0 %v2021_v63 }
 0x229   :  { %2168 = vmatprep.mubr.f32.mxu1 %v2029_v11 }
 0x25b   :  { %v2213_v44 = vpop.f32.mrf.mxu0  ;;  %v2257_v45 = vpop.f32.mrf.mxu1 }
 0x25d   :  { %v2214_v46 = vpop.f32.mrf.mxu0  ;;  %v2258_v47 = vpop.f32.mrf.mxu1 }
 0x25e   :  { %v2215_v39 = vadd.f32 %v2214_v46, %v2213_v44  ;;  %v2259_v40 = vadd.f32 %v2258_v47, %v2257_v45 }
 0x260   :  { %v1324_v4 = vadd.f32 %v2259_v40, %v2215_v39 }
 0x267   :  { %v2216_v48 = vpop.f32.mrf.mxu0 }
 0x268   :  { %v2260_v49 = vpop.f32.mrf.mxu1 }
 0x269   :  { %v2217_v50 = vpop.f32.mrf.mxu0 }
 0x26a   :  { %v2261_v51 = vpop.f32.mrf.mxu1  ;;  %v2218_v18 = vadd.f32 %v2217_v50, %v2216_v48 }
 0x26b   :  { %v2219_v53 = vpop.f32.mrf.mxu0  ;;  %v2262_v19 = vadd.f32 %v2261_v51, %v2260_v49 }
 0x26c   :  { %v2263_v62 = vpop.f32.mrf.mxu1 }
 0x26d   :  { %v2220_v56 = vpop.f32.mrf.mxu0  ;;  %v1329_v32 = vadd.f32 %v2262_v19, %v2218_v18 }
 0x26e   :  { %v2264_v57 = vpop.f32.mrf.mxu1  ;;  %v2221_v24 = vadd.f32 %v2220_v56, %v2219_v53 }
 0x26f   :  { %v2265_v31 = vadd.f32 %v2264_v57, %v2263_v62 }
 0x271   :  { %v1334_v11 = vadd.f32 %v2265_v31, %v2221_v24 }
 0x275   :  { %v2222_v60 = vpop.f32.mrf.mxu0 }
 0x276   :  { %v2266_v61 = vpop.f32.mrf.mxu1 }
 0x277   :  { %v2223_v54 = vpop.f32.mrf.mxu0 }
 0x278   :  { %v2267_v52 = vpop.f32.mrf.mxu1  ;;  %v2224_v46 = vadd.f32 %v2223_v54, %v2222_v60 }
 0x279   :  { %v2268_v47 = vadd.f32 %v2267_v52, %v2266_v61 }
 0x28b   :  { %v2301_v55 = vpop.f32.mrf.mxu0 }
 0x28c   :  { %v2345_v58 = vpop.f32.mrf.mxu1 }
 0x28d   :  { %v2302_v7 = vpop.f32.mrf.mxu0 }
 0x28e   :  { %v2346_v59 = vpop.f32.mrf.mxu1  ;;  %v2303_v23 = vadd.f32 %v2302_v7, %v2301_v55 }
 0x28f   :  { %v2347_v5 = vadd.f32 %v2346_v59, %v2345_v58 }
 0x290   :  { %v1409_v43 = vadd.f32 %v2303_v23, %v1324_v4 }
 0x291   :  { %v2304_v2 = vpop.f32.mrf.mxu0 }
 0x292   :  { %v2348_v12 = vpop.f32.mrf.mxu1  ;;  %v1494_v50 = vadd.f32 %v2347_v5, %v1409_v43 }
 0x293   :  { %v2305_v8 = vpop.f32.mrf.mxu0 }
 0x294   :  { %v2349_v9 = vpop.f32.mrf.mxu1  ;;  %v2306_v20 = vadd.f32 %v2305_v8, %v2304_v2  ;;  %v1339_v8 = vadd.f32 %v2268_v47, %v2224_v46 }
 0x295   :  { %v2350_v48 = vadd.f32 %v2349_v9, %v2348_v12 }
 0x296   :  { %v1414_v42 = vadd.f32 %v2306_v20, %v1329_v32 }
 0x297   :  { %v2307_v21 = vpop.f32.mrf.mxu0 }
 0x298   :  { %v2351_v10 = vpop.f32.mrf.mxu1  ;;  %v1499_v53 = vadd.f32 %v2350_v48, %v1414_v42 }
 0x299   :  { %v2308_v13 = vpop.f32.mrf.mxu0 }
 0x29a   :  { %v2352_v26 = vpop.f32.mrf.mxu1  ;;  %v2309_v63 = vadd.f32 %v2308_v13, %v2307_v21 }
 0x29b   :  { %v2353_v21 = vadd.f32 %v2352_v26, %v2351_v10 }
 0x29c   :  { %v1419_v62 = vadd.f32 %v2309_v63, %v1334_v11 }
 0x29d   :  { %v2310_v22 = vpop.f32.mrf.mxu0 }
 0x29e   :  { %v3919_v28 = vpop.f32.mrf.mxu1  ;;  %v1504_v61 = vadd.f32 %v2353_v21, %v1419_v62 }
 0x29f   :  { %v2311_v25 = vpop.f32.mrf.mxu0 }
 0x2a0   :  { %v3921_v27 = vpop.f32.mrf.mxu1  ;;  %v2312_v56 = vadd.f32 %v2311_v25, %v2310_v22 }
 0x2a1   :  { %v2356_v5 = vadd.f32 %v3921_v27, %v3919_v28 }
 0x2a2   :  { %v1424_v54 = vadd.f32 %v2312_v56, %v1339_v8 }
 0x2b3   :  { %v2389_v29 = vpop.f32.mrf.mxu0 }
 0x2b4   :  { %v2433_v30 = vpop.f32.mrf.mxu1 }
 0x2b5   :  { %v2390_v33 = vpop.f32.mrf.mxu0 }
 0x2b6   :  { %v2434_v34 = vpop.f32.mrf.mxu1  ;;  %v2391_v35 = vadd.f32 %v2390_v33, %v2389_v29 }
 0x2b7   :  { %v2435_v59 = vadd.f32 %v2434_v34, %v2433_v30  ;;  %v1509_v30 = vadd.f32 %v2356_v5, %v1424_v54 }
 0x2b8   :  { %v1579_v57 = vadd.f32 %v2391_v35, %v1494_v50 }
 0x2b9   :  { %v2392_v1 = vpop.f32.mrf.mxu0 }
 0x2ba   :  { %v2436_v14 = vpop.f32.mrf.mxu1  ;;  %v1664_v12 = vadd.f32 %v2435_v59, %v1579_v57 }
 0x2bb   :  { %v2393_v36 = vpop.f32.mrf.mxu0 }
 0x2bc   :  { %v2437_v37 = vpop.f32.mrf.mxu1  ;;  %v2394_v49 = vadd.f32 %v2393_v36, %v2392_v1 }
 0x2bd   :  { %v2438_v52 = vadd.f32 %v2437_v37, %v2436_v14 }
 0x2be   :  { %v1584_v13 = vadd.f32 %v2394_v49, %v1499_v53 }
 0x2bf   :  { %v2395_v38 = vpop.f32.mrf.mxu0 }
 0x2c0   :  { %v2439_v15 = vpop.f32.mrf.mxu1  ;;  %v1669_v25 = vadd.f32 %v2438_v52, %v1584_v13 }
 0x2c1   :  { %v2396_v16 = vpop.f32.mrf.mxu0 }
 0x2c2   :  { %v2440_v17 = vpop.f32.mrf.mxu1  ;;  %v2397_v58 = vadd.f32 %v2396_v16, %v2395_v38 }
 0x2c3   :  { %v2441_v34 = vadd.f32 %v2440_v17, %v2439_v15 }
 0x2c4   :  { %v1589_v35 = vadd.f32 %v2397_v58, %v1504_v61 }
 0x2c5   :  { %v2398_v41 = vpop.f32.mrf.mxu0 }
 0x2c6   :  { %v2442_v6 = vpop.f32.mrf.mxu1  ;;  %v1674_v37 = vadd.f32 %v2441_v34, %v1589_v35  ;;  %v1883_v35 = vld [vmem:[%s3972_s6] sm:$0x1] }
 0x2c7   :  { %v2399_v44 = vpop.f32.mrf.mxu0 }
 0x2c8   :  { %v2443_v45 = vpop.f32.mrf.mxu1  ;;  %v2400_v1 = vadd.f32 %v2399_v44, %v2398_v41 }
 0x2c9   :  { %v2444_v24 = vadd.f32 %v2443_v45, %v2442_v6 }
 0x2ca   :  { %v1594_v19 = vadd.f32 %v2400_v1, %v1509_v30 }
 0x2cc   :  { %v1679_v42 = vadd.f32 %v2444_v24, %v1594_v19 }
 0x2db   :  { %v2477_v51 = vpop.f32.mrf.mxu0 }
 0x2dc   :  { %v2521_v55 = vpop.f32.mrf.mxu1 }
 0x2dd   :  { %v2478_v7 = vpop.f32.mrf.mxu0 }
 0x2de   :  { %v2522_v2 = vpop.f32.mrf.mxu1  ;;  %v2479_v29 = vadd.f32 %v2478_v7, %v2477_v51 }
 0x2df   :  { %v2480_v33 = vpop.f32.mrf.mxu0  ;;  %v2523_v16 = vadd.f32 %v2522_v2, %v2521_v55 }
 0x2e0   :  { %v2524_v60 = vpop.f32.mrf.mxu1  ;;  %v1749_v10 = vadd.f32 %v2479_v29, %v1664_v12 }
 0x2e1   :  { %v2481_v9 = vpop.f32.mrf.mxu0 }
 0x2e2   :  { %v2525_v22 = vpop.f32.mrf.mxu1  ;;  %v2482_v36 = vadd.f32 %v2481_v9, %v2480_v33  ;;  %v1834_v23 = vadd.f32 %v2523_v16, %v1749_v10  ;;  %v1879_v9 = vld [vmem:[%s3971_s5] sm:$0x1] }
 0x2e3   :  { %v2483_v26 = vpop.f32.mrf.mxu0  ;;  %v2526_v40 = vadd.f32 %v2525_v22, %v2524_v60 }
 0x2e4   :  { %v2527_v38 = vpop.f32.mrf.mxu1  ;;  %v1754_v39 = vadd.f32 %v2482_v36, %v1669_v25  ;;  %v1862_v11 = vmul.f32 %v1834_v23, %v1834_v23 }
 0x2e5   :  { %v2484_v18 = vpop.f32.mrf.mxu0 }
 0x2e6   :  { %v2528_v14 = vpop.f32.mrf.mxu1  ;;  %v1839_v28 = vadd.f32 %v2526_v40, %v1754_v39  ;;  %v2485_v27 = vadd.f32 %v2484_v18, %v2483_v26 }
 0x2e7   :  { %v2486_v20 = vpop.f32.mrf.mxu0  ;;  %v2529_v41 = vadd.f32 %v2528_v14, %v2527_v38 }
 0x2e8   :  { %v2530_v4 = vpop.f32.mrf.mxu1  ;;  %v1759_v31 = vadd.f32 %v2485_v27, %v1674_v37  ;;  %v1863_v63 = vmul.f32 %v1839_v28, %v1839_v28  ;;  %v1852_v44 = vadd.f32 %v1839_v28, %v1834_v23 }
 0x2e9   :  { %v2487_v32 = vpop.f32.mrf.mxu0 }
 0x2ea   :  { %v2531_v43 = vpop.f32.mrf.mxu1  ;;  %v1844_v15 = vadd.f32 %v2529_v41, %v1759_v31  ;;  %v2488_v17 = vadd.f32 %v2487_v32, %v2486_v20  ;;  %v1866_v49 = vadd.f32 %v1863_v63, %v1862_v11 }
 0x2eb   :  { %v2532_v48 = vadd.f32 %v2531_v43, %v2530_v4 }
 0x2ec   :  { %v1864_v46 = vmul.f32 %v1844_v15, %v1844_v15  ;;  %v1764_v47 = vadd.f32 %v2488_v17, %v1679_v42  ;;  %v1853_v50 = vadd.f32 %v1852_v44, %v1844_v15 }
 0x2ee   :  { %v1849_v51 = vadd.f32 %v2532_v48, %v1764_v47  ;;  %v1867_v55 = vadd.f32 %v1866_v49, %v1864_v46 }
 0x2f0   :  { %v1854_v53 = vadd.f32 %v1853_v50, %v1849_v51  ;;  %v1865_v62 = vmul.f32 %v1849_v51, %v1849_v51 }
 0x2f2   :  { %v1855_v6 = vrot.slane %v1854_v53, 4  ;;  %v1868_v45 = vadd.f32 %v1867_v55, %v1865_v62 }
 0x2f4   :  { %v1856_v56 = vadd.f32 %v1855_v6, %v1854_v53  ;;  %v1869_v57 = vrot.slane %v1868_v45, 4 }
 0x2f6   :  { %v1857_v7 = vrot.slane %v1856_v56, 2  ;;  %v1870_v2 = vadd.f32 %v1869_v57, %v1868_v45 }
 0x2f8   :  { %v1858_v8 = vadd.f32 %v1857_v7, %v1856_v56  ;;  %v1871_v21 = vrot.slane %v1870_v2, 2 }
 0x2fa   :  { %v1859_v13 = vrot.slane %v1858_v8, 1  ;;  %v1872_v58 = vadd.f32 %v1871_v21, %v1870_v2  ;;  %v3979_v2 = vld [vmem:[#allocation6_spill] sm:$0xff] }
 0x2fc   :  { %v1860_v59 = vadd.f32 %v1859_v13, %v1858_v8  ;;  %v1873_v29 = vrot.slane %v1872_v58, 1  ;;  %v2017_v8 = vrot.slane %v3979_v2, %v3188_v0 }
 0x2fe   :  { %v1861_v33 = vmul.f32 0.035714287, %v1860_v59  ;;  %v1874_v60 = vadd.f32 %v1873_v29, %v1872_v58  ;;  %v3980_v58 = vld [vmem:[#allocation5_spill] sm:$0xff] }
 0x2ff   :  { %v2025_v59 = vrot.slane %v3979_v2, %v3980_v58 }
 0x300   :  { %v1875_v61 = vmul.f32 0.035714287, %v1874_v60  ;;  %v1876_v54 = vmul.f32 %v1861_v33, %v1861_v33 }
 0x302   :  { %v1877_v52 = vsub.f32 %v1875_v61, %v1876_v54 }
 0x304   :  { %v1878_v5 = vmax.f32 %v1877_v52, 0.0 }
 0x306   :  { %v1880_v12 = vadd.f32 1e-05, %v1878_v5 }
 0x308   :  { %2546 = vrsqrt.f32 %v1880_v12 }
 0x315   :  { %v2547_v22 = vpop.eup %2546 }
 0x316   :  { %v1882_v25 = vmul.f32 %v2547_v22, %v1879_v9 }
 0x318   :  { %v1884_v1 = vmul.f32 %v1882_v25, %v1861_v33  ;;  %v1890_v36 = vrot.slane %v1882_v25, %v3188_v0 }
 0x31a   :  { %v1885_v10 = vsub.f32 %v1883_v35, %v1884_v1  ;;  %v1892_v26 = vmul.f32 %v1890_v36, %v1834_v23  ;;  %v1893_v38 = vmul.f32 %v1890_v36, %v1839_v28  ;;  %v1894_v30 = vmul.f32 %v1890_v36, %v1844_v15 }
 0x31b   :  { %v1895_v34 = vmul.f32 %v1890_v36, %v1849_v51 }
 0x31c   :  { %v1900_v39 = vrot.slane %v1885_v10, %v3188_v0 }
 0x31e   :  { %v1902_v40 = vadd.f32 %v1900_v39, %v1892_v26  ;;  %v1903_v16 = vadd.f32 %v1900_v39, %v1893_v38  ;;  %v1904_v18 = vadd.f32 %v1900_v39, %v1894_v30  ;;  %v1905_v14 = vadd.f32 %v1900_v39, %v1895_v34 }
 0x320   :  { %v3942_v37 = vmax.f32 %v1902_v40, 0.0  ;;  %v1907_v19 = vmax.f32 %v1903_v16, 0.0  ;;  %v1908_v27 = vmax.f32 %v1904_v18, 0.0  ;;  %v1909_v20 = vmax.f32 %v1905_v14, 0.0 }
 0x322   :  { %1935 = vst [vmem:[#allocation4 + $0xa8] sm:$0x3f] %v1907_v19  ;;  %1937 = vst [vmem:[#allocation4 + $0x28] sm:$0x3f] %v1909_v20  ;;  %v1942_v4 = vrot.slane %v3942_v37, 7  ;;  %v1943_v24 = vrot.slane %v1907_v19, 7 }
 0x323   :  { %v1945_v23 = vrot.slane %v1908_v27, 7  ;;  %v1946_v28 = vrot.slane %v1909_v20, 7  ;;  %v1956_v31 = vrot.slane %v3942_v37, 6  ;;  %v1957_v41 = vrot.slane %v1907_v19, 6 }
 0x324   :  { %v1959_v32 = vrot.slane %v1908_v27, 6  ;;  %v1960_v43 = vrot.slane %v1909_v20, 6  ;;  %v1970_v63 = vrot.slane %v3942_v37, 5  ;;  %v1971_v15 = vrot.slane %v1907_v19, 5  ;;  %1952 = vst [vmem:[#allocation4 + $0x30] sm:$0xfe] %v1942_v4 }
 0x325   :  { %v1947_v42 = vsel %vm681_vm4, %v1945_v23, %v1946_v28  ;;  %1954 = vst [vmem:[#allocation4 + $0x70] sm:$0xfe] %v1945_v23  ;;  %v1973_v17 = vrot.slane %v1908_v27, 5  ;;  %v1974_v44 = vrot.slane %v1909_v20, 5  ;;  %1966 = vst [vmem:[#allocation4 + $0x50] sm:$0xfc] %v1956_v31  ;;  %v1944_v46 = vsel %vm681_vm4, %v1942_v4, %v1943_v24 }
 0x326   :  { %1955 = vst [vmem:[#allocation4 + $0x98] sm:$0x7f] %v1947_v42  ;;  %v1961_v11 = vsel %vm738_vm5, %v1959_v32, %v1960_v43  ;;  %1968 = vst [vmem:[#allocation4 + $0x18] sm:$0xfc] %v1959_v32  ;;  %v1958_v47 = vsel %vm738_vm5, %v1956_v31, %v1957_v41  ;;  %v1972_v48 = vsel %vm795_vm6, %v1970_v63, %v1971_v15 }
 0x327   :  { %1985 = vst [vmem:[#allocation4 + $0x8] sm:$0xf8] %v1973_v17  ;;  %1982 = vst [vmem:[#allocation4 + $0x40] sm:$0xf8] %v1970_v63  ;;  %v1975_v49 = vsel %vm795_vm6, %v1973_v17, %v1974_v44 }
 0x328   :  { %1984 = vst [vmem:[#allocation4 + $0xb0] sm:$0x1] %v1971_v15  ;;  %1953 = vst [vmem:[#allocation4 + $0x20] sm:$0x7f] %v1944_v46 }
 0x329   :  { %1987 = vst [vmem:[#allocation4 + $0xa0] sm:$0x1] %v1974_v44  ;;  %v2004_v51 = vld [vmem:[#allocation4 + $0x28] sm:$0xff] }
 0x32a   :  { %v1992_v57 = vld [vmem:[#allocation4 + $0xa8] sm:$0xff] }
 0x32b   :  { %v1989_v7 = vld [vmem:[#allocation4 + $0x30] sm:$0xff] }
 0x32c   :  { %v2001_v53 = vld [vmem:[#allocation4 + $0x70] sm:$0xff] }
 0x32d   :  { %v2005_v50 = vld [vmem:[#allocation4 + $0x98] sm:$0xff]  ;;  %v1990_v13 = vld [vmem:[#allocation4 + $0x50] sm:$0xff] }
 0x32e   :  { %2056 = vmatprep.subr.mxu0 %v2005_v50  ;;  %v2003_v62 = vld [vmem:[#allocation4 + $0x8] sm:$0xff]  ;;  %v2002_v45 = vld [vmem:[#allocation4 + $0x18] sm:$0xff]  ;;  %v1991_v21 = vld [vmem:[#allocation4 + $0x40] sm:$0xff] }
 0x32f   :  { %2057 = vmatpush1.xpose.msra.mxu0 %v2004_v51  ;;  %v1993_v6 = vld [vmem:[#allocation4 + $0x20] sm:$0xff]  ;;  %v1999_v56 = vld [vmem:[#allocation4 + $0xb0] sm:$0xff] }
 0x330   :  { %v2011_v55 = vld [vmem:[#allocation4 + $0xa0] sm:$0xff]  ;;  %2058 = vmatprep.subr.mxu0 %v2001_v53 }
 0x331   :  { %2124 = vmatprep.subr.mxu1 %v2011_v55 }
 0x332   :  { %2125 = vmatpush1.xpose.msra.mxu1 %v3915_v3 }
 0x333   :  { %2126 = vmatprep.subr.mxu1 %v1975_v49  ;;  %2059 = vmatpush1.xpose.msra.mxu0 %v1908_v27 }
 0x334   :  { %2060 = vmatprep.subr.mxu0 %v3915_v3 }
 0x336   :  { %2127 = vmatpush1.xpose.msra.mxu1 %v1961_v11 }
 0x337   :  { %2128 = vmatprep.subr.mxu1 %v2003_v62  ;;  %2061 = vmatpush1.xpose.msra.mxu0 %v3915_v3 }
 0x338   :  { %2062 = vmatprep.subr.mxu0 %v1993_v6 }
 0x33a   :  { %2129 = vmatpush1.xpose.msra.mxu1 %v2002_v45 }
 0x33b   :  { %2130 = vmatprep.subr.mxu1 %v1999_v56  ;;  %2063 = vmatpush1.xpose.msra.mxu0 %v1992_v57 }
 0x33c   :  { %2064 = vmatprep.subr.mxu0 %v1989_v7 }
 0x33e   :  { %2131 = vmatpush1.xpose.msra.mxu1 %v3915_v3 }
 0x33f   :  { %2132 = vmatprep.subr.mxu1 %v1972_v48  ;;  %2065 = vmatpush1.xpose.msra.mxu0 %v3942_v37 }
 0x342   :  { %2133 = vmatpush1.xpose.msra.mxu1 %v1958_v47  ;;  %2099 = vmatmul.mubr.f32.vlgmr.msra.gmra.mxu0 %v2017_v8 }
 0x343   :  { %2134 = vmatprep.subr.mxu1 %v1991_v21 }
 0x346   :  { %2135 = vmatpush1.xpose.msra.mxu1 %v1990_v13 }
 0x349   :  { %2169 = vmatmul.mubr.f32.vlgmr.msra.gmra.mxu1 %v2025_v59 }
 0x402   :  { %v2100_v29 = vpop.f32.mrf.mxu0 }
 0x404   :  { %v2102_v33 = vpop.f32.mrf.mxu0 }
 0x409   :  { %v2170_v60 = vpop.f32.mrf.mxu1 }
 0x40a   :  { %v2171_v3 = vadd.f32 %v2170_v60, %v2100_v29 }
 0x40b   :  { %v2172_v61 = vpop.f32.mrf.mxu1 }
 0x40c   :  { %2548 = vtanh.f32 %v2171_v3 }
 0x419   :  { %v2549_v0 = vpop.eup %2548 }
 0x41a   :  { %2176 = vst.msk [vmem:[%s3973_s8] sm:$0x1] %vm2175_vm7, %v2549_v0 }

</bundles_post_ra>
